<compile_context>
chip_gen: v7x
topology: tpu7x:2x2x1
jax: 0.10.0
libtpu: 0.0.40
codegen_flags: <defaults>
</compile_context>

<pallas_src>
import jax
import jax.numpy as jnp
from jax.experimental import pallas as pl
from jax.experimental.pallas import tpu as pltpu

BF16 = jnp.bfloat16
F32 = jnp.float32
N_PITCH = 84            # real output pitches (kernel stores a 128-lane padded slab)
OUT_LANES = 128         # lane-dense padded output width
D_LANES = 512           # lane-dense padded width of the 7*64 = 448 layer-d output


def _dotb(x, w):
    """bf16 x bf16 MXU matmul with f32 accumulation (both operands cast)."""
    return jnp.dot(x.astype(BF16), w.astype(BF16), preferred_element_type=F32)


# -----------------------------------------------------------------------------
# Fused kernel: chords tempnet + per-track melody tempnet + latent assembly +
# full BarGenerator, one grid step per track.
# -----------------------------------------------------------------------------
def _generator_kernel(
        chords_ref, style_ref, melody_ref, groove_ref,          # runtime inputs
        cw1_ref, cb1_ref, cw2_ref, cb2_ref,                     # chords tempnet (replicated)
        mw1_ref, mb1_ref, mw2_ref, mb2_ref,                     # melody tempnet (per track)
        wl_ref, bl_ref, wa_ref, ba_ref, wb_ref, bb_ref,         # bar generator (per track)
        wc_ref, bc_ref, wd_ref, bd_ref, we_ref, be_ref,
        o_ref, h_ref):                                          # output + VMEM slab
    relu = lambda v: jnp.maximum(v, 0.0)

    def tempnet(x, w1, b1, w2, b2):
        h = relu(_dotb(x, w1[...]) + b1[...])
        return relu(_dotb(h, w2[...]) + b2[...])        # (B, n_bars*z), bar-major cols

    batch, z_dim = chords_ref.shape
    n_bars = cw2_ref.shape[1] // z_dim

    chords_ot = tempnet(chords_ref[...], cw1_ref, cb1_ref, cw2_ref, cb2_ref)
    melody_ot = tempnet(melody_ref[...], mw1_ref, mb1_ref, mw2_ref, mb2_ref)
    style = style_ref[...]
    groove = groove_ref[...]

    # Latent z = [c, s, m, g] for every (bar, batch) row of this track.
    z_rows = [
        jnp.concatenate(
            [chords_ot[:, bar * z_dim:(bar + 1) * z_dim], style,
             melody_ot[:, bar * z_dim:(bar + 1) * z_dim], groove], axis=1)
        for bar in range(n_bars)
    ]
    z_lat = jnp.concatenate(z_rows, axis=0)              # (n_bars*B, 4*z)

    m0 = n_bars * batch
    c0 = wa_ref.shape[0]

    # Dense layer (BN folded) + torch reshape as block expansion: one
    # 8-sublane-aligned store (2*m0 == 8 at these shapes).
    h0 = relu(_dotb(z_lat, wl_ref[...]) + bl_ref[...])                   # (m0, 2*c0)
    h_ref[0:2 * m0, 0:c0] = jnp.concatenate([h0[:, 0:c0], h0[:, c0:2 * c0]], axis=0)
    rows = 2 * m0

    # Three ConvTranspose2d layers (kernel == stride == 2 on the time axis):
    # channel matmul + lane-slice -> row-block expansion inside VMEM.
    for w_ref_, b_ref_ in ((wa_ref, ba_ref), (wb_ref, bb_ref), (wc_ref, bc_ref)):
        c_in = w_ref_.shape[0]
        c_out = w_ref_.shape[1] // 2
        y = relu(_dotb(h_ref[0:rows, 0:c_in], w_ref_[...]) + b_ref_[...])  # (rows, 2*c_out)
        h_ref[0:rows, 0:c_out] = y[:, 0:c_out]
        h_ref[rows:2 * rows, 0:c_out] = y[:, c_out:2 * c_out]
        rows = 2 * rows

    # ConvT d (width kernel 7, padded to 512 lanes) fused with the final
    # block-diagonalized ConvT e (1x12 kernel, padded to 128 lanes) + tanh.
    c_in = wd_ref.shape[0]
    yd = relu(_dotb(h_ref[0:rows, 0:c_in], wd_ref[...]) + bd_ref[...])     # (rows, 512)
    o_ref[...] = jnp.tanh(_dotb(yd, we_ref[...]) + be_ref[...])            # (rows, 128)


# -----------------------------------------------------------------------------
# Forward pass wrapper: one pallas_call + tiny input transposes / final relayout.
# -----------------------------------------------------------------------------
def generator_forward(params, chords_input, style_input, melody_input, groove_input):
    ct, mt, bp = params["chords_tempnet"], params["melody_tempnets"], params["bargens"]
    batch, z_dim = chords_input.shape
    n_tracks = melody_input.shape[1]
    n_bars = ct["w2"].shape[1] // z_dim
    rows_out = 16 * n_bars * batch

    melody_t = jnp.transpose(melody_input, (1, 0, 2))    # (T, B, z)
    groove_t = jnp.transpose(groove_input, (1, 0, 2))    # (T, B, z)

    rep2 = lambda a: pl.BlockSpec(a.shape, lambda i: (0, 0))                # replicated 2-D
    trk3 = lambda a: pl.BlockSpec((None,) + a.shape[1:], lambda i: (i, 0, 0))  # per-track 3-D

    operands = [
        chords_input, style_input, melody_t, groove_t,
        ct["w1"], ct["b1"], ct["w2"], ct["b2"],
        mt["w1"], mt["b1"], mt["w2"], mt["b2"],
        bp["wl"], bp["bl"], bp["wa"], bp["ba"], bp["wb"], bp["bb"],
        bp["wc"], bp["bc"], bp["wd"], bp["bd"], bp["we"], bp["be"],
    ]
    in_specs = [
        rep2(chords_input), rep2(style_input), trk3(melody_t), trk3(groove_t),
        rep2(ct["w1"]), rep2(ct["b1"]), rep2(ct["w2"]), rep2(ct["b2"]),
        trk3(mt["w1"]), trk3(mt["b1"]), trk3(mt["w2"]), trk3(mt["b2"]),
        trk3(bp["wl"]), trk3(bp["bl"]), trk3(bp["wa"]), trk3(bp["ba"]),
        trk3(bp["wb"]), trk3(bp["bb"]), trk3(bp["wc"]), trk3(bp["bc"]),
        trk3(bp["wd"]), trk3(bp["bd"]), trk3(bp["we"]), trk3(bp["be"]),
    ]

    bars = pl.pallas_call(
        _generator_kernel,
        out_shape=jax.ShapeDtypeStruct((n_tracks, rows_out, OUT_LANES), jnp.float32),
        grid=(n_tracks,),
        in_specs=in_specs,
        out_specs=pl.BlockSpec((None, rows_out, OUT_LANES), lambda i: (i, 0, 0)),
        scratch_shapes=[pltpu.VMEM((rows_out, bp["wa"].shape[1]), jnp.float32)],
        compiler_params=pltpu.CompilerParams(dimension_semantics=("parallel",)),
    )(*operands)

    # Drop the lane padding and undo the kernel's block-expansion row order
    # (r_c, r_b, r_a, t1, bar, b) -> (B, track, bar, time = t1*8+r_a*4+r_b*2+r_c).
    bars = bars[..., :N_PITCH].reshape(n_tracks, 2, 2, 2, 2, n_bars, batch, N_PITCH)
    bars = jnp.transpose(bars, (6, 0, 5, 4, 3, 2, 1, 7))
    return bars.reshape(batch, n_tracks, n_bars, 16, N_PITCH)


# -----------------------------------------------------------------------------
# Deterministic synthetic parameters (BN folded, bf16 weights, f32 biases).
# -----------------------------------------------------------------------------
def _normal(key, shape, scale=0.05):
    return scale * jax.random.normal(key, shape, dtype=jnp.float32)


def _bn_affine(key, c, eps=1e-5):
    kg, kb, km, kv = jax.random.split(key, 4)
    gamma = 1.0 + 0.1 * jax.random.normal(kg, (c,), jnp.float32)
    beta = 0.1 * jax.random.normal(kb, (c,), jnp.float32)
    rmean = 0.1 * jax.random.normal(km, (c,), jnp.float32)
    rvar = 1.0 + 0.1 * jax.random.uniform(kv, (c,), jnp.float32)
    scale = gamma / jnp.sqrt(rvar + eps)
    shift = beta - rmean * scale
    return scale, shift


def _fold(w, b, scale, shift):
    # act((x@W + b)*scale + shift) == act(x@(W*scale) + (b*scale + shift))
    return w * scale[None, :], (b * scale + shift)[None, :]


def init_temporal_net(key, z_dim, hid_c, n_bars=2):
    k = jax.random.split(key, 6)
    # ConvTranspose2d(z, hid, kernel=(2,1)) on a 1x1 input == per-bar linear;
    # columns bar-major: col = bar*hid + c.
    w1 = _normal(k[0], (z_dim, n_bars, hid_c)).reshape(z_dim, n_bars * hid_c)
    b1 = jnp.tile(_normal(k[1], (hid_c,)), n_bars)
    s1, t1 = _bn_affine(k[2], hid_c)
    w1, b1 = _fold(w1, b1, jnp.tile(s1, n_bars), jnp.tile(t1, n_bars))
    # ConvTranspose2d(hid, z, kernel=(1,1)) == per-bar linear; block-diagonalized
    # over bars so layer 2 is a single lane-dense matmul.
    w2 = _normal(k[3], (hid_c, z_dim))
    b2 = _normal(k[4], (z_dim,))
    s2, t2 = _bn_affine(k[5], z_dim)
    w2, b2 = _fold(w2, b2, s2, t2)
    w2_blk = jnp.kron(jnp.eye(n_bars, dtype=jnp.float32), w2)     # (n_bars*hid, n_bars*z)
    b2_blk = jnp.tile(b2, (1, n_bars))
    return dict(w1=w1.astype(BF16), b1=b1, w2=w2_blk.astype(BF16), b2=b2_blk)


def init_bar_generator(key, z_dim, hid_f=256):
    c0 = hid_f // 2    # 128
    c1 = c0 // 2       # 64
    keys = jax.random.split(key, 17)

    # Linear(4z, hid_f) + BN + ReLU; columns (time t1, channel c) t-major.
    wl = _normal(keys[0], (4 * z_dim, hid_f))
    bl = _normal(keys[1], (hid_f,))
    sl, tl = _bn_affine(keys[2], hid_f)
    wl, bl = _fold(wl, bl, sl, tl)

    def convt(kw_, kb_, kbn_, cin, cout, k):
        # ConvTranspose2d(cin, cout, kernel=k, stride=k): cols = offset*cout + c.
        w = _normal(kw_, (cin, k, cout)).reshape(cin, k * cout)
        b = jnp.tile(_normal(kb_, (cout,)), k)
        s, t = _bn_affine(kbn_, cout)
        return _fold(w, b, jnp.tile(s, k), jnp.tile(t, k))

    wa, ba = convt(keys[3], keys[4], keys[5], c0, c0, 2)
    wb, bb = convt(keys[6], keys[7], keys[8], c0, c1, 2)
    wc, bc = convt(keys[9], keys[10], keys[11], c1, c1, 2)
    wd, bd = convt(keys[12], keys[13], keys[14], c1, c1, 7)

    # Pad the 7*c1 = 448 wide layer-d output to 512 lanes (zero columns).
    d_pad = D_LANES - 7 * c1
    wd = jnp.pad(wd, ((0, 0), (0, d_pad)))
    bd = jnp.pad(bd, ((0, 0), (0, d_pad)))

    # Final ConvTranspose2d(c1, 1, kernel=(1,12), stride=(1,12)) + Tanh (no BN),
    # block-diagonalized over the 7 width positions of layer d and zero-padded
    # to a lane-dense (512, 128) matmul.
    we = _normal(keys[15], (c1, 12))
    we_blk = jnp.kron(jnp.eye(7, dtype=jnp.float32), we)           # (448, 84)
    we_blk = jnp.pad(we_blk, ((0, d_pad), (0, OUT_LANES - N_PITCH)))  # (512, 128)
    be = jnp.tile(_normal(keys[16], (1,)), 7 * 12)[None, :]        # (1, 84)
    be = jnp.pad(be, ((0, 0), (0, OUT_LANES - N_PITCH)))           # (1, 128)
    return dict(wl=wl.astype(BF16), bl=bl, wa=wa.astype(BF16), ba=ba,
                wb=wb.astype(BF16), bb=bb, wc=wc.astype(BF16), bc=bc,
                wd=wd.astype(BF16), bd=bd, we=we_blk.astype(BF16), be=be)


def init_generator(key, z_dim=32, hid_c=128, n_tracks=4, n_bars=2):
    keys = jax.random.split(key, 1 + 2 * n_tracks)
    chords = init_temporal_net(keys[0], z_dim, hid_c, n_bars)
    melody = [init_temporal_net(keys[1 + t], z_dim, hid_c, n_bars) for t in range(n_tracks)]
    bars = [init_bar_generator(keys[1 + n_tracks + t], z_dim) for t in range(n_tracks)]
    stack = lambda trees: jax.tree_util.tree_map(lambda *xs: jnp.stack(xs, axis=0), *trees)
    return {"chords_tempnet": chords,
            "melody_tempnets": stack(melody),
            "bargens": stack(bars)}


# -----------------------------------------------------------------------------
# Pure-JAX reference with identical bf16 rounding points (tight tolerance check).
# -----------------------------------------------------------------------------
def _reference_forward(params, chords_input, style_input, melody_input, groove_input):
    ct, mt, bp = params["chords_tempnet"], params["melody_tempnets"], params["bargens"]
    B, z_dim = chords_input.shape
    n_tracks = melody_input.shape[1]
    n_bars = ct["w2"].shape[1] // z_dim
    relu = jax.nn.relu

    def tempnet(p, x, idx=None):
        g = (lambda k: p[k][idx]) if idx is not None else (lambda k: p[k])
        h = relu(_dotb(x, g("w1")) + g("b1"))
        y = relu(_dotb(h, g("w2")) + g("b2"))
        return y.reshape(B, n_bars, z_dim)

    chords_ot = tempnet(ct, chords_input)
    melody_ot = [tempnet(mt, melody_input[:, t, :], t) for t in range(n_tracks)]

    bars_out = []
    for bar in range(n_bars):
        tracks = []
        c = chords_ot[:, bar, :]
        for t in range(n_tracks):
            zin = jnp.concatenate(
                [c, style_input, melody_ot[t][:, bar, :], groove_input[:, t, :]], axis=1)
            h = relu(_dotb(zin, bp["wl"][t]) + bp["bl"][t])      # (B, 2*c0), t-major cols
            h = h.reshape(B * 2, -1)                             # rows (b, t1)
            for wk, bk in (("wa", "ba"), ("wb", "bb"), ("wc", "bc")):
                w = bp[wk][t]
                cout = w.shape[1] // 2
                h = relu(_dotb(h, w) + bp[bk][t]).reshape(-1, cout)
            h = relu(_dotb(h, bp["wd"][t]) + bp["bd"][t])        # (B*16, 512)
            out = jnp.tanh(_dotb(h, bp["we"][t]) + bp["be"][t])[:, :N_PITCH]
            tracks.append(out.reshape(B, 1, 1, 16, N_PITCH))
        bars_out.append(jnp.concatenate(tracks, axis=1))
    return jnp.concatenate(bars_out, axis=2)


if __name__ == "__main__":
    B, Z, N_TRACKS, N_BARS, HID_C = 2, 32, 4, 2, 128
    key = jax.random.PRNGKey(0)
    k_in, k_par = jax.random.split(key)
    kc, ks, km, kg = jax.random.split(k_in, 4)
    chords_input = jax.random.normal(kc, (B, Z), jnp.float32)
    style_input = jax.random.normal(ks, (B, Z), jnp.float32)
    melody_input = jax.random.normal(km, (B, N_TRACKS, Z), jnp.float32)
    groove_input = jax.random.normal(kg, (B, N_TRACKS, Z), jnp.float32)

    params = init_generator(k_par, z_dim=Z, hid_c=HID_C, n_tracks=N_TRACKS, n_bars=N_BARS)

    fwd = jax.jit(generator_forward)
    out = jax.block_until_ready(
        fwd(params, chords_input, style_input, melody_input, groove_input))
    ref = _reference_forward(params, chords_input, style_input, melody_input, groove_input)

    assert out.shape == (B, N_TRACKS, N_BARS, 16, N_PITCH), out.shape
    assert bool(jnp.all(jnp.isfinite(out)))
    max_err = float(jnp.max(jnp.abs(out - ref)))
    assert max_err < 5e-3, max_err
    print("KERNEL_OK")
</pallas_src>

<mosaic_0001>
module attributes {stable_mosaic.version = 11 : i64} {
  func.func @_generator_kernel(%arg0: i32, %arg1: memref<2x32xf32, #tpu.memory_space<vmem>>, %arg2: memref<2x32xf32, #tpu.memory_space<vmem>>, %arg3: memref<1x2x32xf32, #tpu.memory_space<vmem>>, %arg4: memref<1x2x32xf32, #tpu.memory_space<vmem>>, %arg5: memref<32x256xbf16, #tpu.memory_space<vmem>>, %arg6: memref<1x256xf32, #tpu.memory_space<vmem>>, %arg7: memref<256x64xbf16, #tpu.memory_space<vmem>>, %arg8: memref<1x64xf32, #tpu.memory_space<vmem>>, %arg9: memref<1x32x256xbf16, #tpu.memory_space<vmem>>, %arg10: memref<1x1x256xf32, #tpu.memory_space<vmem>>, %arg11: memref<1x256x64xbf16, #tpu.memory_space<vmem>>, %arg12: memref<1x1x64xf32, #tpu.memory_space<vmem>>, %arg13: memref<1x128x256xbf16, #tpu.memory_space<vmem>>, %arg14: memref<1x1x256xf32, #tpu.memory_space<vmem>>, %arg15: memref<1x128x256xbf16, #tpu.memory_space<vmem>>, %arg16: memref<1x1x256xf32, #tpu.memory_space<vmem>>, %arg17: memref<1x128x128xbf16, #tpu.memory_space<vmem>>, %arg18: memref<1x1x128xf32, #tpu.memory_space<vmem>>, %arg19: memref<1x64x128xbf16, #tpu.memory_space<vmem>>, %arg20: memref<1x1x128xf32, #tpu.memory_space<vmem>>, %arg21: memref<1x64x512xbf16, #tpu.memory_space<vmem>>, %arg22: memref<1x1x512xf32, #tpu.memory_space<vmem>>, %arg23: memref<1x512x128xbf16, #tpu.memory_space<vmem>>, %arg24: memref<1x1x128xf32, #tpu.memory_space<vmem>>, %arg25: memref<1x64x128xf32, #tpu.memory_space<vmem>>, %arg26: memref<64x128xf32, #tpu.memory_space<vmem>>) attributes {dimension_semantics = [#tpu.dimension_semantics<parallel>], iteration_bounds = array<i64: 4>, scalar_prefetch = 0 : i64, scratch_operands = 1 : i64, tpu.core_type = #tpu.core_type<tc>, window_params = [{pipeline_mode = #tpu.pipeline_mode<synchronous>, transform_indices = @transform_0, window_bounds = array<i64: 2, 32>}, {pipeline_mode = #tpu.pipeline_mode<synchronous>, transform_indices = @transform_1, window_bounds = array<i64: 2, 32>}, {transform_indices = @transform_2, window_bounds = array<i64: 1, 2, 32>}, {transform_indices = @transform_3, window_bounds = array<i64: 1, 2, 32>}, {pipeline_mode = #tpu.pipeline_mode<synchronous>, transform_indices = @transform_4, window_bounds = array<i64: 32, 256>}, {pipeline_mode = #tpu.pipeline_mode<synchronous>, transform_indices = @transform_5, window_bounds = array<i64: 1, 256>}, {pipeline_mode = #tpu.pipeline_mode<synchronous>, transform_indices = @transform_6, window_bounds = array<i64: 256, 64>}, {pipeline_mode = #tpu.pipeline_mode<synchronous>, transform_indices = @transform_7, window_bounds = array<i64: 1, 64>}, {transform_indices = @transform_8, window_bounds = array<i64: 1, 32, 256>}, {transform_indices = @transform_9, window_bounds = array<i64: 1, 1, 256>}, {transform_indices = @transform_10, window_bounds = array<i64: 1, 256, 64>}, {transform_indices = @transform_11, window_bounds = array<i64: 1, 1, 64>}, {transform_indices = @transform_12, window_bounds = array<i64: 1, 128, 256>}, {transform_indices = @transform_13, window_bounds = array<i64: 1, 1, 256>}, {transform_indices = @transform_14, window_bounds = array<i64: 1, 128, 256>}, {transform_indices = @transform_15, window_bounds = array<i64: 1, 1, 256>}, {transform_indices = @transform_16, window_bounds = array<i64: 1, 128, 128>}, {transform_indices = @transform_17, window_bounds = array<i64: 1, 1, 128>}, {transform_indices = @transform_18, window_bounds = array<i64: 1, 64, 128>}, {transform_indices = @transform_19, window_bounds = array<i64: 1, 1, 128>}, {transform_indices = @transform_20, window_bounds = array<i64: 1, 64, 512>}, {transform_indices = @transform_21, window_bounds = array<i64: 1, 1, 512>}, {transform_indices = @transform_22, window_bounds = array<i64: 1, 512, 128>}, {transform_indices = @transform_23, window_bounds = array<i64: 1, 1, 128>}, {transform_indices = @transform_24, window_bounds = array<i64: 1, 64, 128>}]} {
    %c0 = arith.constant 0 : index
    %c0_0 = arith.constant 0 : index
    %0 = vector.load %arg1[%c0, %c0_0] : memref<2x32xf32, #tpu.memory_space<vmem>>, vector<2x32xf32>
    %c0_1 = arith.constant 0 : index
    %c0_2 = arith.constant 0 : index
    %1 = vector.load %arg5[%c0_1, %c0_2] : memref<32x256xbf16, #tpu.memory_space<vmem>>, vector<32x256xbf16>
    %2 = arith.truncf %0 : vector<2x32xf32> to vector<2x32xbf16>
    %cst = arith.constant dense<0.000000e+00> : vector<2x256xf32>
    %3 = tpu.matmul %2, %1, %cst {dimension_numbers = #tpu.dot_dimension_numbers<[1], [0], [0], [1], [0, 0, 1, 1], [], []>} : vector<2x32xbf16>, vector<32x256xbf16>, vector<2x256xf32> -> vector<2x256xf32>
    %c0_3 = arith.constant 0 : index
    %c0_4 = arith.constant 0 : index
    %4 = vector.load %arg6[%c0_3, %c0_4] : memref<1x256xf32, #tpu.memory_space<vmem>>, vector<1x256xf32>
    %5 = vector.broadcast %4 : vector<1x256xf32> to vector<2x256xf32>
    %6 = arith.addf %3, %5 : vector<2x256xf32>
    %cst_5 = arith.constant 0.000000e+00 : f32
    %7 = vector.broadcast %cst_5 : f32 to vector<2x256xf32>
    %8 = arith.maximumf %6, %7 : vector<2x256xf32>
    %c0_6 = arith.constant 0 : index
    %c0_7 = arith.constant 0 : index
    %9 = vector.load %arg7[%c0_6, %c0_7] : memref<256x64xbf16, #tpu.memory_space<vmem>>, vector<256x64xbf16>
    %10 = arith.truncf %8 : vector<2x256xf32> to vector<2x256xbf16>
    %cst_8 = arith.constant dense<0.000000e+00> : vector<2x64xf32>
    %11 = tpu.matmul %10, %9, %cst_8 {dimension_numbers = #tpu.dot_dimension_numbers<[1], [0], [0], [1], [0, 0, 1, 1], [], []>} : vector<2x256xbf16>, vector<256x64xbf16>, vector<2x64xf32> -> vector<2x64xf32>
    %c0_9 = arith.constant 0 : index
    %c0_10 = arith.constant 0 : index
    %12 = vector.load %arg8[%c0_9, %c0_10] : memref<1x64xf32, #tpu.memory_space<vmem>>, vector<1x64xf32>
    %13 = vector.broadcast %12 : vector<1x64xf32> to vector<2x64xf32>
    %14 = arith.addf %11, %13 : vector<2x64xf32>
    %cst_11 = arith.constant 0.000000e+00 : f32
    %15 = vector.broadcast %cst_11 : f32 to vector<2x64xf32>
    %16 = arith.maximumf %14, %15 : vector<2x64xf32>
    %c0_12 = arith.constant 0 : index
    %c0_13 = arith.constant 0 : index
    %c0_14 = arith.constant 0 : index
    %17 = vector.load %arg3[%c0_12, %c0_13, %c0_14] : memref<1x2x32xf32, #tpu.memory_space<vmem>>, vector<1x2x32xf32>
    %18 = vector.shape_cast %17 : vector<1x2x32xf32> to vector<2x32xf32>
    %c0_15 = arith.constant 0 : index
    %c0_16 = arith.constant 0 : index
    %c0_17 = arith.constant 0 : index
    %19 = vector.load %arg9[%c0_15, %c0_16, %c0_17] : memref<1x32x256xbf16, #tpu.memory_space<vmem>>, vector<1x32x256xbf16>
    %20 = vector.shape_cast %19 : vector<1x32x256xbf16> to vector<32x256xbf16>
    %21 = arith.truncf %18 : vector<2x32xf32> to vector<2x32xbf16>
    %cst_18 = arith.constant dense<0.000000e+00> : vector<2x256xf32>
    %22 = tpu.matmul %21, %20, %cst_18 {dimension_numbers = #tpu.dot_dimension_numbers<[1], [0], [0], [1], [0, 0, 1, 1], [], []>} : vector<2x32xbf16>, vector<32x256xbf16>, vector<2x256xf32> -> vector<2x256xf32>
    %c0_19 = arith.constant 0 : index
    %c0_20 = arith.constant 0 : index
    %c0_21 = arith.constant 0 : index
    %23 = vector.load %arg10[%c0_19, %c0_20, %c0_21] : memref<1x1x256xf32, #tpu.memory_space<vmem>>, vector<1x1x256xf32>
    %24 = vector.shape_cast %23 : vector<1x1x256xf32> to vector<1x256xf32>
    %25 = vector.broadcast %24 : vector<1x256xf32> to vector<2x256xf32>
    %26 = arith.addf %22, %25 : vector<2x256xf32>
    %cst_22 = arith.constant 0.000000e+00 : f32
    %27 = vector.broadcast %cst_22 : f32 to vector<2x256xf32>
    %28 = arith.maximumf %26, %27 : vector<2x256xf32>
    %c0_23 = arith.constant 0 : index
    %c0_24 = arith.constant 0 : index
    %c0_25 = arith.constant 0 : index
    %29 = vector.load %arg11[%c0_23, %c0_24, %c0_25] : memref<1x256x64xbf16, #tpu.memory_space<vmem>>, vector<1x256x64xbf16>
    %30 = vector.shape_cast %29 : vector<1x256x64xbf16> to vector<256x64xbf16>
    %31 = arith.truncf %28 : vector<2x256xf32> to vector<2x256xbf16>
    %cst_26 = arith.constant dense<0.000000e+00> : vector<2x64xf32>
    %32 = tpu.matmul %31, %30, %cst_26 {dimension_numbers = #tpu.dot_dimension_numbers<[1], [0], [0], [1], [0, 0, 1, 1], [], []>} : vector<2x256xbf16>, vector<256x64xbf16>, vector<2x64xf32> -> vector<2x64xf32>
    %c0_27 = arith.constant 0 : index
    %c0_28 = arith.constant 0 : index
    %c0_29 = arith.constant 0 : index
    %33 = vector.load %arg12[%c0_27, %c0_28, %c0_29] : memref<1x1x64xf32, #tpu.memory_space<vmem>>, vector<1x1x64xf32>
    %34 = vector.shape_cast %33 : vector<1x1x64xf32> to vector<1x64xf32>
    %35 = vector.broadcast %34 : vector<1x64xf32> to vector<2x64xf32>
    %36 = arith.addf %32, %35 : vector<2x64xf32>
    %cst_30 = arith.constant 0.000000e+00 : f32
    %37 = vector.broadcast %cst_30 : f32 to vector<2x64xf32>
    %38 = arith.maximumf %36, %37 : vector<2x64xf32>
    %c0_31 = arith.constant 0 : index
    %c0_32 = arith.constant 0 : index
    %39 = vector.load %arg2[%c0_31, %c0_32] : memref<2x32xf32, #tpu.memory_space<vmem>>, vector<2x32xf32>
    %c0_33 = arith.constant 0 : index
    %c0_34 = arith.constant 0 : index
    %c0_35 = arith.constant 0 : index
    %40 = vector.load %arg4[%c0_33, %c0_34, %c0_35] : memref<1x2x32xf32, #tpu.memory_space<vmem>>, vector<1x2x32xf32>
    %41 = vector.shape_cast %40 : vector<1x2x32xf32> to vector<2x32xf32>
    %42 = vector.extract_strided_slice %16 {offsets = [0, 0], sizes = [2, 32], strides = [1, 1]} : vector<2x64xf32> to vector<2x32xf32>
    %43 = vector.extract_strided_slice %38 {offsets = [0, 0], sizes = [2, 32], strides = [1, 1]} : vector<2x64xf32> to vector<2x32xf32>
    %44 = tpu.concatenate %42, %39, %43, %41 in 1 : vector<2x32xf32>, vector<2x32xf32>, vector<2x32xf32>, vector<2x32xf32> -> vector<2x128xf32>
    %45 = vector.extract_strided_slice %16 {offsets = [0, 32], sizes = [2, 32], strides = [1, 1]} : vector<2x64xf32> to vector<2x32xf32>
    %46 = vector.extract_strided_slice %38 {offsets = [0, 32], sizes = [2, 32], strides = [1, 1]} : vector<2x64xf32> to vector<2x32xf32>
    %47 = tpu.concatenate %45, %39, %46, %41 in 1 : vector<2x32xf32>, vector<2x32xf32>, vector<2x32xf32>, vector<2x32xf32> -> vector<2x128xf32>
    %48 = tpu.concatenate %44, %47 in 0 : vector<2x128xf32>, vector<2x128xf32> -> vector<4x128xf32>
    %c0_36 = arith.constant 0 : index
    %c0_37 = arith.constant 0 : index
    %c0_38 = arith.constant 0 : index
    %49 = vector.load %arg13[%c0_36, %c0_37, %c0_38] : memref<1x128x256xbf16, #tpu.memory_space<vmem>>, vector<1x128x256xbf16>
    %50 = vector.shape_cast %49 : vector<1x128x256xbf16> to vector<128x256xbf16>
    %51 = arith.truncf %48 : vector<4x128xf32> to vector<4x128xbf16>
    %cst_39 = arith.constant dense<0.000000e+00> : vector<4x256xf32>
    %52 = tpu.matmul %51, %50, %cst_39 {dimension_numbers = #tpu.dot_dimension_numbers<[1], [0], [0], [1], [0, 0, 1, 1], [], []>} : vector<4x128xbf16>, vector<128x256xbf16>, vector<4x256xf32> -> vector<4x256xf32>
    %c0_40 = arith.constant 0 : index
    %c0_41 = arith.constant 0 : index
    %c0_42 = arith.constant 0 : index
    %53 = vector.load %arg14[%c0_40, %c0_41, %c0_42] : memref<1x1x256xf32, #tpu.memory_space<vmem>>, vector<1x1x256xf32>
    %54 = vector.shape_cast %53 : vector<1x1x256xf32> to vector<1x256xf32>
    %55 = vector.broadcast %54 : vector<1x256xf32> to vector<4x256xf32>
    %56 = arith.addf %52, %55 : vector<4x256xf32>
    %cst_43 = arith.constant 0.000000e+00 : f32
    %57 = vector.broadcast %cst_43 : f32 to vector<4x256xf32>
    %58 = arith.maximumf %56, %57 : vector<4x256xf32>
    %59 = vector.extract_strided_slice %58 {offsets = [0, 0], sizes = [4, 128], strides = [1, 1]} : vector<4x256xf32> to vector<4x128xf32>
    %60 = vector.extract_strided_slice %58 {offsets = [0, 128], sizes = [4, 128], strides = [1, 1]} : vector<4x256xf32> to vector<4x128xf32>
    %61 = tpu.concatenate %59, %60 in 0 : vector<4x128xf32>, vector<4x128xf32> -> vector<8x128xf32>
    %c0_44 = arith.constant 0 : index
    %c0_45 = arith.constant 0 : index
    %62 = vector.load %arg26[%c0_44, %c0_45] : memref<64x128xf32, #tpu.memory_space<vmem>>, vector<8x128xf32>
    tpu.vector_store %arg26[%c0_44, %c0_45], %61 {strides = array<i32>} : memref<64x128xf32, #tpu.memory_space<vmem>>, vector<8x128xf32>,
    %c0_46 = arith.constant 0 : index
    %c0_47 = arith.constant 0 : index
    %63 = vector.load %arg26[%c0_46, %c0_47] : memref<64x128xf32, #tpu.memory_space<vmem>>, vector<8x128xf32>
    %c0_48 = arith.constant 0 : index
    %c0_49 = arith.constant 0 : index
    %c0_50 = arith.constant 0 : index
    %64 = vector.load %arg15[%c0_48, %c0_49, %c0_50] : memref<1x128x256xbf16, #tpu.memory_space<vmem>>, vector<1x128x256xbf16>
    %65 = vector.shape_cast %64 : vector<1x128x256xbf16> to vector<128x256xbf16>
    %66 = arith.truncf %63 : vector<8x128xf32> to vector<8x128xbf16>
    %cst_51 = arith.constant dense<0.000000e+00> : vector<8x256xf32>
    %67 = tpu.matmul %66, %65, %cst_51 {dimension_numbers = #tpu.dot_dimension_numbers<[1], [0], [0], [1], [0, 0, 1, 1], [], []>} : vector<8x128xbf16>, vector<128x256xbf16>, vector<8x256xf32> -> vector<8x256xf32>
    %c0_52 = arith.constant 0 : index
    %c0_53 = arith.constant 0 : index
    %c0_54 = arith.constant 0 : index
    %68 = vector.load %arg16[%c0_52, %c0_53, %c0_54] : memref<1x1x256xf32, #tpu.memory_space<vmem>>, vector<1x1x256xf32>
    %69 = vector.shape_cast %68 : vector<1x1x256xf32> to vector<1x256xf32>
    %70 = vector.broadcast %69 : vector<1x256xf32> to vector<8x256xf32>
    %71 = arith.addf %67, %70 : vector<8x256xf32>
    %cst_55 = arith.constant 0.000000e+00 : f32
    %72 = vector.broadcast %cst_55 : f32 to vector<8x256xf32>
    %73 = arith.maximumf %71, %72 : vector<8x256xf32>
    %74 = vector.extract_strided_slice %73 {offsets = [0, 0], sizes = [8, 128], strides = [1, 1]} : vector<8x256xf32> to vector<8x128xf32>
    %c0_56 = arith.constant 0 : index
    %c0_57 = arith.constant 0 : index
    %75 = vector.load %arg26[%c0_56, %c0_57] : memref<64x128xf32, #tpu.memory_space<vmem>>, vector<8x128xf32>
    tpu.vector_store %arg26[%c0_56, %c0_57], %74 {strides = array<i32>} : memref<64x128xf32, #tpu.memory_space<vmem>>, vector<8x128xf32>,
    %76 = vector.extract_strided_slice %73 {offsets = [0, 128], sizes = [8, 128], strides = [1, 1]} : vector<8x256xf32> to vector<8x128xf32>
    %c8 = arith.constant 8 : index
    %c0_58 = arith.constant 0 : index
    %77 = vector.load %arg26[%c8, %c0_58] : memref<64x128xf32, #tpu.memory_space<vmem>>, vector<8x128xf32>
    tpu.vector_store %arg26[%c8, %c0_58], %76 {strides = array<i32>} : memref<64x128xf32, #tpu.memory_space<vmem>>, vector<8x128xf32>,
    %c0_59 = arith.constant 0 : index
    %c0_60 = arith.constant 0 : index
    %78 = vector.load %arg26[%c0_59, %c0_60] : memref<64x128xf32, #tpu.memory_space<vmem>>, vector<16x128xf32>
    %c0_61 = arith.constant 0 : index
    %c0_62 = arith.constant 0 : index
    %c0_63 = arith.constant 0 : index
    %79 = vector.load %arg17[%c0_61, %c0_62, %c0_63] : memref<1x128x128xbf16, #tpu.memory_space<vmem>>, vector<1x128x128xbf16>
    %80 = vector.shape_cast %79 : vector<1x128x128xbf16> to vector<128x128xbf16>
    %81 = arith.truncf %78 : vector<16x128xf32> to vector<16x128xbf16>
    %cst_64 = arith.constant dense<0.000000e+00> : vector<16x128xf32>
    %82 = tpu.matmul %81, %80, %cst_64 {dimension_numbers = #tpu.dot_dimension_numbers<[1], [0], [0], [1], [0, 0, 1, 1], [], []>} : vector<16x128xbf16>, vector<128x128xbf16>, vector<16x128xf32> -> vector<16x128xf32>
    %c0_65 = arith.constant 0 : index
    %c0_66 = arith.constant 0 : index
    %c0_67 = arith.constant 0 : index
    %83 = vector.load %arg18[%c0_65, %c0_66, %c0_67] : memref<1x1x128xf32, #tpu.memory_space<vmem>>, vector<1x1x128xf32>
    %84 = vector.shape_cast %83 : vector<1x1x128xf32> to vector<1x128xf32>
    %85 = vector.broadcast %84 : vector<1x128xf32> to vector<16x128xf32>
    %86 = arith.addf %82, %85 : vector<16x128xf32>
    %cst_68 = arith.constant 0.000000e+00 : f32
    %87 = vector.broadcast %cst_68 : f32 to vector<16x128xf32>
    %88 = arith.maximumf %86, %87 : vector<16x128xf32>
    %89 = vector.extract_strided_slice %88 {offsets = [0, 0], sizes = [16, 64], strides = [1, 1]} : vector<16x128xf32> to vector<16x64xf32>
    %c0_69 = arith.constant 0 : index
    %c0_70 = arith.constant 0 : index
    %90 = vector.load %arg26[%c0_69, %c0_70] : memref<64x128xf32, #tpu.memory_space<vmem>>, vector<16x64xf32>
    tpu.vector_store %arg26[%c0_69, %c0_70], %89 {strides = array<i32>} : memref<64x128xf32, #tpu.memory_space<vmem>>, vector<16x64xf32>,
    %91 = vector.extract_strided_slice %88 {offsets = [0, 64], sizes = [16, 64], strides = [1, 1]} : vector<16x128xf32> to vector<16x64xf32>
    %c16 = arith.constant 16 : index
    %c0_71 = arith.constant 0 : index
    %92 = vector.load %arg26[%c16, %c0_71] : memref<64x128xf32, #tpu.memory_space<vmem>>, vector<16x64xf32>
    tpu.vector_store %arg26[%c16, %c0_71], %91 {strides = array<i32>} : memref<64x128xf32, #tpu.memory_space<vmem>>, vector<16x64xf32>,
    %c0_72 = arith.constant 0 : index
    %c0_73 = arith.constant 0 : index
    %93 = vector.load %arg26[%c0_72, %c0_73] : memref<64x128xf32, #tpu.memory_space<vmem>>, vector<32x64xf32>
    %c0_74 = arith.constant 0 : index
    %c0_75 = arith.constant 0 : index
    %c0_76 = arith.constant 0 : index
    %94 = vector.load %arg19[%c0_74, %c0_75, %c0_76] : memref<1x64x128xbf16, #tpu.memory_space<vmem>>, vector<1x64x128xbf16>
    %95 = vector.shape_cast %94 : vector<1x64x128xbf16> to vector<64x128xbf16>
    %96 = arith.truncf %93 : vector<32x64xf32> to vector<32x64xbf16>
    %cst_77 = arith.constant dense<0.000000e+00> : vector<32x128xf32>
    %97 = tpu.matmul %96, %95, %cst_77 {dimension_numbers = #tpu.dot_dimension_numbers<[1], [0], [0], [1], [0, 0, 1, 1], [], []>} : vector<32x64xbf16>, vector<64x128xbf16>, vector<32x128xf32> -> vector<32x128xf32>
    %c0_78 = arith.constant 0 : index
    %c0_79 = arith.constant 0 : index
    %c0_80 = arith.constant 0 : index
    %98 = vector.load %arg20[%c0_78, %c0_79, %c0_80] : memref<1x1x128xf32, #tpu.memory_space<vmem>>, vector<1x1x128xf32>
    %99 = vector.shape_cast %98 : vector<1x1x128xf32> to vector<1x128xf32>
    %100 = vector.broadcast %99 : vector<1x128xf32> to vector<32x128xf32>
    %101 = arith.addf %97, %100 : vector<32x128xf32>
    %cst_81 = arith.constant 0.000000e+00 : f32
    %102 = vector.broadcast %cst_81 : f32 to vector<32x128xf32>
    %103 = arith.maximumf %101, %102 : vector<32x128xf32>
    %104 = vector.extract_strided_slice %103 {offsets = [0, 0], sizes = [32, 64], strides = [1, 1]} : vector<32x128xf32> to vector<32x64xf32>
    %c0_82 = arith.constant 0 : index
    %c0_83 = arith.constant 0 : index
    %105 = vector.load %arg26[%c0_82, %c0_83] : memref<64x128xf32, #tpu.memory_space<vmem>>, vector<32x64xf32>
    tpu.vector_store %arg26[%c0_82, %c0_83], %104 {strides = array<i32>} : memref<64x128xf32, #tpu.memory_space<vmem>>, vector<32x64xf32>,
    %106 = vector.extract_strided_slice %103 {offsets = [0, 64], sizes = [32, 64], strides = [1, 1]} : vector<32x128xf32> to vector<32x64xf32>
    %c32 = arith.constant 32 : index
    %c0_84 = arith.constant 0 : index
    %107 = vector.load %arg26[%c32, %c0_84] : memref<64x128xf32, #tpu.memory_space<vmem>>, vector<32x64xf32>
    tpu.vector_store %arg26[%c32, %c0_84], %106 {strides = array<i32>} : memref<64x128xf32, #tpu.memory_space<vmem>>, vector<32x64xf32>,
    %c0_85 = arith.constant 0 : index
    %c0_86 = arith.constant 0 : index
    %108 = vector.load %arg26[%c0_85, %c0_86] : memref<64x128xf32, #tpu.memory_space<vmem>>, vector<64x64xf32>
    %c0_87 = arith.constant 0 : index
    %c0_88 = arith.constant 0 : index
    %c0_89 = arith.constant 0 : index
    %109 = vector.load %arg21[%c0_87, %c0_88, %c0_89] : memref<1x64x512xbf16, #tpu.memory_space<vmem>>, vector<1x64x512xbf16>
    %110 = vector.shape_cast %109 : vector<1x64x512xbf16> to vector<64x512xbf16>
    %111 = arith.truncf %108 : vector<64x64xf32> to vector<64x64xbf16>
    %cst_90 = arith.constant dense<0.000000e+00> : vector<64x512xf32>
    %112 = tpu.matmul %111, %110, %cst_90 {dimension_numbers = #tpu.dot_dimension_numbers<[1], [0], [0], [1], [0, 0, 1, 1], [], []>} : vector<64x64xbf16>, vector<64x512xbf16>, vector<64x512xf32> -> vector<64x512xf32>
    %c0_91 = arith.constant 0 : index
    %c0_92 = arith.constant 0 : index
    %c0_93 = arith.constant 0 : index
    %113 = vector.load %arg22[%c0_91, %c0_92, %c0_93] : memref<1x1x512xf32, #tpu.memory_space<vmem>>, vector<1x1x512xf32>
    %114 = vector.shape_cast %113 : vector<1x1x512xf32> to vector<1x512xf32>
    %115 = vector.broadcast %114 : vector<1x512xf32> to vector<64x512xf32>
    %116 = arith.addf %112, %115 : vector<64x512xf32>
    %cst_94 = arith.constant 0.000000e+00 : f32
    %117 = vector.broadcast %cst_94 : f32 to vector<64x512xf32>
    %118 = arith.maximumf %116, %117 : vector<64x512xf32>
    %c0_95 = arith.constant 0 : index
    %c0_96 = arith.constant 0 : index
    %c0_97 = arith.constant 0 : index
    %119 = vector.load %arg23[%c0_95, %c0_96, %c0_97] : memref<1x512x128xbf16, #tpu.memory_space<vmem>>, vector<1x512x128xbf16>
    %120 = vector.shape_cast %119 : vector<1x512x128xbf16> to vector<512x128xbf16>
    %121 = arith.truncf %118 : vector<64x512xf32> to vector<64x512xbf16>
    %cst_98 = arith.constant dense<0.000000e+00> : vector<64x128xf32>
    %122 = tpu.matmul %121, %120, %cst_98 {dimension_numbers = #tpu.dot_dimension_numbers<[1], [0], [0], [1], [0, 0, 1, 1], [], []>} : vector<64x512xbf16>, vector<512x128xbf16>, vector<64x128xf32> -> vector<64x128xf32>
    %c0_99 = arith.constant 0 : index
    %c0_100 = arith.constant 0 : index
    %c0_101 = arith.constant 0 : index
    %123 = vector.load %arg24[%c0_99, %c0_100, %c0_101] : memref<1x1x128xf32, #tpu.memory_space<vmem>>, vector<1x1x128xf32>
    %124 = vector.shape_cast %123 : vector<1x1x128xf32> to vector<1x128xf32>
    %125 = vector.broadcast %124 : vector<1x128xf32> to vector<64x128xf32>
    %126 = arith.addf %122, %125 : vector<64x128xf32>
    %127 = math.tanh %126 : vector<64x128xf32>
    %c0_102 = arith.constant 0 : index
    %c0_103 = arith.constant 0 : index
    %c0_104 = arith.constant 0 : index
    %128 = vector.load %arg25[%c0_102, %c0_103, %c0_104] : memref<1x64x128xf32, #tpu.memory_space<vmem>>, vector<1x64x128xf32>
    %129 = vector.shape_cast %128 : vector<1x64x128xf32> to vector<64x128xf32>
    %130 = vector.shape_cast %127 : vector<64x128xf32> to vector<1x64x128xf32>
    tpu.vector_store %arg25[%c0_102, %c0_103, %c0_104], %130 {strides = array<i32>} : memref<1x64x128xf32, #tpu.memory_space<vmem>>, vector<1x64x128xf32>,
    return
  }
  func.func @transform_0(%arg0: i32) -> (i32, i32) {
    %c0_i32 = arith.constant 0 : i32
    %c0_i32_0 = arith.constant 0 : i32
    %c0_i32_1 = arith.constant 0 : i32
    return %c0_i32, %c0_i32_0 : i32, i32
  }
  func.func @transform_1(%arg0: i32) -> (i32, i32) {
    %c0_i32 = arith.constant 0 : i32
    %c0_i32_0 = arith.constant 0 : i32
    %c0_i32_1 = arith.constant 0 : i32
    return %c0_i32, %c0_i32_0 : i32, i32
  }
  func.func @transform_2(%arg0: i32) -> (i32, i32, i32) {
    %c0_i32 = arith.constant 0 : i32
    %c0_i32_0 = arith.constant 0 : i32
    %c0_i32_1 = arith.constant 0 : i32
    return %arg0, %c0_i32, %c0_i32_0 : i32, i32, i32
  }
  func.func @transform_3(%arg0: i32) -> (i32, i32, i32) {
    %c0_i32 = arith.constant 0 : i32
    %c0_i32_0 = arith.constant 0 : i32
    %c0_i32_1 = arith.constant 0 : i32
    return %arg0, %c0_i32, %c0_i32_0 : i32, i32, i32
  }
  func.func @transform_4(%arg0: i32) -> (i32, i32) {
    %c0_i32 = arith.constant 0 : i32
    %c0_i32_0 = arith.constant 0 : i32
    %c0_i32_1 = arith.constant 0 : i32
    return %c0_i32, %c0_i32_0 : i32, i32
  }
  func.func @transform_5(%arg0: i32) -> (i32, i32) {
    %c0_i32 = arith.constant 0 : i32
    %c0_i32_0 = arith.constant 0 : i32
    %c0_i32_1 = arith.constant 0 : i32
    return %c0_i32, %c0_i32_0 : i32, i32
  }
  func.func @transform_6(%arg0: i32) -> (i32, i32) {
    %c0_i32 = arith.constant 0 : i32
    %c0_i32_0 = arith.constant 0 : i32
    %c0_i32_1 = arith.constant 0 : i32
    return %c0_i32, %c0_i32_0 : i32, i32
  }
  func.func @transform_7(%arg0: i32) -> (i32, i32) {
    %c0_i32 = arith.constant 0 : i32
    %c0_i32_0 = arith.constant 0 : i32
    %c0_i32_1 = arith.constant 0 : i32
    return %c0_i32, %c0_i32_0 : i32, i32
  }
  func.func @transform_8(%arg0: i32) -> (i32, i32, i32) {
    %c0_i32 = arith.constant 0 : i32
    %c0_i32_0 = arith.constant 0 : i32
    %c0_i32_1 = arith.constant 0 : i32
    return %arg0, %c0_i32, %c0_i32_0 : i32, i32, i32
  }
  func.func @transform_9(%arg0: i32) -> (i32, i32, i32) {
    %c0_i32 = arith.constant 0 : i32
    %c0_i32_0 = arith.constant 0 : i32
    %c0_i32_1 = arith.constant 0 : i32
    return %arg0, %c0_i32, %c0_i32_0 : i32, i32, i32
  }
  func.func @transform_10(%arg0: i32) -> (i32, i32, i32) {
    %c0_i32 = arith.constant 0 : i32
    %c0_i32_0 = arith.constant 0 : i32
    %c0_i32_1 = arith.constant 0 : i32
    return %arg0, %c0_i32, %c0_i32_0 : i32, i32, i32
  }
  func.func @transform_11(%arg0: i32) -> (i32, i32, i32) {
    %c0_i32 = arith.constant 0 : i32
    %c0_i32_0 = arith.constant 0 : i32
    %c0_i32_1 = arith.constant 0 : i32
    return %arg0, %c0_i32, %c0_i32_0 : i32, i32, i32
  }
  func.func @transform_12(%arg0: i32) -> (i32, i32, i32) {
    %c0_i32 = arith.constant 0 : i32
    %c0_i32_0 = arith.constant 0 : i32
    %c0_i32_1 = arith.constant 0 : i32
    return %arg0, %c0_i32, %c0_i32_0 : i32, i32, i32
  }
  func.func @transform_13(%arg0: i32) -> (i32, i32, i32) {
    %c0_i32 = arith.constant 0 : i32
    %c0_i32_0 = arith.constant 0 : i32
    %c0_i32_1 = arith.constant 0 : i32
    return %arg0, %c0_i32, %c0_i32_0 : i32, i32, i32
  }
  func.func @transform_14(%arg0: i32) -> (i32, i32, i32) {
    %c0_i32 = arith.constant 0 : i32
    %c0_i32_0 = arith.constant 0 : i32
    %c0_i32_1 = arith.constant 0 : i32
    return %arg0, %c0_i32, %c0_i32_0 : i32, i32, i32
  }
  func.func @transform_15(%arg0: i32) -> (i32, i32, i32) {
    %c0_i32 = arith.constant 0 : i32
    %c0_i32_0 = arith.constant 0 : i32
    %c0_i32_1 = arith.constant 0 : i32
    return %arg0, %c0_i32, %c0_i32_0 : i32, i32, i32
  }
  func.func @transform_16(%arg0: i32) -> (i32, i32, i32) {
    %c0_i32 = arith.constant 0 : i32
    %c0_i32_0 = arith.constant 0 : i32
    %c0_i32_1 = arith.constant 0 : i32
    return %arg0, %c0_i32, %c0_i32_0 : i32, i32, i32
  }
  func.func @transform_17(%arg0: i32) -> (i32, i32, i32) {
    %c0_i32 = arith.constant 0 : i32
    %c0_i32_0 = arith.constant 0 : i32
    %c0_i32_1 = arith.constant 0 : i32
    return %arg0, %c0_i32, %c0_i32_0 : i32, i32, i32
  }
  func.func @transform_18(%arg0: i32) -> (i32, i32, i32) {
    %c0_i32 = arith.constant 0 : i32
    %c0_i32_0 = arith.constant 0 : i32
    %c0_i32_1 = arith.constant 0 : i32
    return %arg0, %c0_i32, %c0_i32_0 : i32, i32, i32
  }
  func.func @transform_19(%arg0: i32) -> (i32, i32, i32) {
    %c0_i32 = arith.constant 0 : i32
    %c0_i32_0 = arith.constant 0 : i32
    %c0_i32_1 = arith.constant 0 : i32
    return %arg0, %c0_i32, %c0_i32_0 : i32, i32, i32
  }
  func.func @transform_20(%arg0: i32) -> (i32, i32, i32) {
    %c0_i32 = arith.constant 0 : i32
    %c0_i32_0 = arith.constant 0 : i32
    %c0_i32_1 = arith.constant 0 : i32
    return %arg0, %c0_i32, %c0_i32_0 : i32, i32, i32
  }
  func.func @transform_21(%arg0: i32) -> (i32, i32, i32) {
    %c0_i32 = arith.constant 0 : i32
    %c0_i32_0 = arith.constant 0 : i32
    %c0_i32_1 = arith.constant 0 : i32
    return %arg0, %c0_i32, %c0_i32_0 : i32, i32, i32
  }
  func.func @transform_22(%arg0: i32) -> (i32, i32, i32) {
    %c0_i32 = arith.constant 0 : i32
    %c0_i32_0 = arith.constant 0 : i32
    %c0_i32_1 = arith.constant 0 : i32
    return %arg0, %c0_i32, %c0_i32_0 : i32, i32, i32
  }
  func.func @transform_23(%arg0: i32) -> (i32, i32, i32) {
    %c0_i32 = arith.constant 0 : i32
    %c0_i32_0 = arith.constant 0 : i32
    %c0_i32_1 = arith.constant 0 : i32
    return %arg0, %c0_i32, %c0_i32_0 : i32, i32, i32
  }
  func.func @transform_24(%arg0: i32) -> (i32, i32, i32) {
    %c0_i32 = arith.constant 0 : i32
    %c0_i32_0 = arith.constant 0 : i32
    %c0_i32_1 = arith.constant 0 : i32
    return %arg0, %c0_i32, %c0_i32_0 : i32, i32, i32
  }
}

</mosaic_0001>

<bundles_post_ra>
// kernel: generator_forward.1
= control target key start
LH: loop header
LB: loop body
LE: loop exit
PB: predicated region body
PF: predicated region fallthrough
CT: control target
= control target key end

     0   :  { %s5906_s0 = inlined_call_operand.vmem [shape: f32[2,32], index: 0, kind: input, shape index: {}]   ;;  %s5907_s1 = inlined_call_operand.vmem [shape: f32[2,32], index: 1, kind: input, shape index: {}]   ;;  %s5908_s2 = inlined_call_operand.vmem [shape: f32[4,2,32], index: 2, kind: input, shape index: {}]   ;;  %s5909_s3 = inlined_call_operand.vmem [shape: f32[4,2,32], index: 3, kind: input, shape index: {}]   ;;  %s5910_s4 = inlined_call_operand.hbm [shape: bf16[32,256], index: 4, kind: input, shape index: {}]   ;;  %s5911_s5 = inlined_call_operand.hbm [shape: f32[1,256], index: 5, kind: input, shape index: {}]   ;;  %s5912_s6 = inlined_call_operand.vmem [shape: bf16[256,64], index: 6, kind: input, shape index: {}]   ;;  %s5913_s7 = inlined_call_operand.hbm [shape: f32[1,64], index: 7, kind: input, shape index: {}]   ;;  %s5914_s8 = inlined_call_operand.hbm [shape: bf16[4,32,256], index: 8, kind: input, shape index: {}]   ;;  %s5915_s9 = inlined_call_operand.vmem [shape: f32[4,1,256], index: 9, kind: input, shape index: {}]   ;;  %s5916_s10 = inlined_call_operand.vmem [shape: bf16[4,256,64], index: 10, kind: input, shape index: {}]   ;;  %s5917_s11 = inlined_call_operand.vmem [shape: f32[4,1,64], index: 11, kind: input, shape index: {}]   ;;  %s5918_s12 = inlined_call_operand.hbm [shape: bf16[4,128,256], index: 12, kind: input, shape index: {}]   ;;  %s5919_s13 = inlined_call_operand.hbm [shape: f32[4,1,256], index: 13, kind: input, shape index: {}]   ;;  %s5920_s14 = inlined_call_operand.hbm [shape: bf16[4,128,256], index: 14, kind: input, shape index: {}]   ;;  %s5921_s15 = inlined_call_operand.hbm [shape: f32[4,1,256], index: 15, kind: input, shape index: {}]   ;;  %s5922_s16 = inlined_call_operand.hbm [shape: bf16[4,128,128], index: 16, kind: input, shape index: {}]   ;;  %s5923_s17 = inlined_call_operand.hbm [shape: f32[4,1,128], index: 17, kind: input, shape index: {}]   ;;  %s5924_s18 = inlined_call_operand.hbm [shape: bf16[4,64,128], index: 18, kind: input, shape index: {}]   ;;  %s5925_s19 = inlined_call_operand.hbm [shape: f32[4,1,128], index: 19, kind: input, shape index: {}]   ;;  %s5926_s20 = inlined_call_operand.hbm [shape: bf16[4,64,512], index: 20, kind: input, shape index: {}]   ;;  %s5927_s21 = inlined_call_operand.hbm [shape: f32[4,1,512], index: 21, kind: input, shape index: {}]   ;;  %s5928_s22 = inlined_call_operand.vmem [shape: bf16[4,512,128], index: 22, kind: input, shape index: {}]   ;;  %s5929_s23 = inlined_call_operand.hbm [shape: f32[4,1,128], index: 23, kind: input, shape index: {}]   ;;  %s5930_s24 = inlined_call_operand.vmem [shape: f32[4,64,128], index: 24, kind: output, shape index: {}]  }
   0x1   :  { %5977 = sst [smem:[#allocation41_spill]] %s5906_s0 }
   0x2   :  { %5978 = sst [smem:[#allocation42_spill]] %s5907_s1 }
   0x3   :  { %5979 = sst [smem:[#allocation43_spill]] %s5908_s2 }
   0x4   :  { %5980 = sst [smem:[#allocation44_spill]] %s5909_s3 }
   0x5   :  { %5981 = sst [smem:[#allocation45_spill]] %s5910_s4 }
   0x6   :  { %5982 = sst [smem:[#allocation46_spill]] %s5911_s5 }
   0x7   :  { %5983 = sst [smem:[#allocation47_spill]] %s5912_s6 }
   0x8   :  { %5984 = sst [smem:[#allocation48_spill]] %s5913_s7 }
   0x9   :  { %5985 = sst [smem:[#allocation49_spill]] %s5914_s8 }
   0xa   :  { %5986 = sst [smem:[#allocation50_spill]] %s5915_s9 }
   0xb   :  { %5987 = sst [smem:[#allocation51_spill]] %s5916_s10 }
   0xc   :  { %5988 = sst [smem:[#allocation52_spill]] %s5917_s11 }
   0xd   :  { %5989 = sst [smem:[#allocation53_spill]] %s5918_s12 }
   0xe   :  { %5990 = sst [smem:[#allocation54_spill]] %s5919_s13 }
   0xf   :  { %5991 = sst [smem:[#allocation55_spill]] %s5920_s14 }
  0x10   :  { %5992 = sst [smem:[#allocation56_spill]] %s5921_s15 }
  0x11   :  { %5993 = sst [smem:[#allocation57_spill]] %s5923_s17 }
  0x12   :  { %5994 = sst [smem:[#allocation58_spill]] %s5926_s20 }
  0x13   :  { %5995 = sst [smem:[#allocation59_spill]] %s5928_s22 }
  0x14   :  { %5996 = sst [smem:[#allocation60_spill]] %s5929_s23 }
  0x15   :  { %5997 = sst [smem:[#allocation61_spill]] %s5930_s24 }
  0x16   :  { %29 = vsyncpa [#allocation4], 0 }
  0x17   :  { %30 = vsyncpa [#allocation6], 0 }
  0x18   :  { %31 = vsyncpa [#allocation9], 0 }
  0x19   :  { %33 = vsyncpa [#allocation9 + $0x1], 0 }
  0x1a   :  { %34 = vsyncpa [#allocation12], 0 }
  0x1b   :  { %36 = vsyncpa [#allocation12 + $0x1], 0 }
  0x1c   :  { %37 = vsyncpa [#allocation15], 0 }
  0x1d   :  { %39 = vsyncpa [#allocation15 + $0x1], 0 }
  0x1e   :  { %40 = vsyncpa [#allocation18], 0 }
  0x1f   :  { %42 = vsyncpa [#allocation18 + $0x1], 0 }
  0x20   :  { %43 = vsyncpa [#allocation21], 0 }
  0x21   :  { %45 = vsyncpa [#allocation21 + $0x1], 0 }
  0x22   :  { %46 = vsyncpa [#allocation24], 0 }
  0x23   :  { %48 = vsyncpa [#allocation24 + $0x1], 0  ;;  %s4944_s5 = smov 0   ;;  %s4946_s26 = smov 0  }
  0x24   :  { %s4948_s27 = smov 0   ;;  %s4950_s28 = smov 0  }
  0x25 LB: > { %5998 = sst [smem:[#allocation34_spill]] %s4782_s26  ;;  %s4963_s6 = sadd.s32 4294967295, %s4790_s28   ;;  %s4790_s28 = sphi %s4950_s28, %s6066_s28   ;;  %s4786_s27 = sphi %s4948_s27, %s6069_s27   ;;  %s4782_s26 = sphi %s4946_s26, %s6068_s26   ;;  %s4778_s5 = sphi %s4944_s5, %s6067_s5  }
  0x26   : > { %5999 = sst [smem:[#allocation35_spill]] %s4786_s27  ;;  %s4966_s2 = sadd.s32 1, %s4790_s28  }
  0x27   : > { %6000 = sst [smem:[#allocation36_spill]] %s4963_s6  ;;  %s236_s29 = ssub.s32 %s4790_s28, %s4966_s2 }
  0x28   : > { %6001 = sst [smem:[#allocation37_spill]] %s4966_s2  ;;  %s239_s0 = sadd.s32 1, %s4786_s27 }
  0x29   : > { %p237_p0 = scmp.eq.s32.totalorder %s236_s29, 0  ;;  %p246_p1 = scmp.ne.s32.totalorder %s4786_s27, %s4782_s26 }
  0x2a   : > { %p247_p2 = scmp.eq.s32.totalorder %s4790_s28, 0  ;;  %p252_p3 = scmp.ne.s32.totalorder %s4782_s26, %s4778_s5 }
  0x2b   : > { %s4976_s7 = scalar_select %p237_p0, %s4786_s27, %s239_s0  }
  0x2c   : > { %p4978_p4 = por %p247_p2, %p246_p1  ;;  %p5939_p5 = scmp.eq.s32.totalorder %s4963_s6, 0 }
  0x2d   : > { %6002 = sst [smem:[#allocation38_spill]] %s4976_s7  ;;  %p3570_p6 = scmp.ge.s32.totalorder %s4790_s28, 1 }
  0x2e   : > { %p679_p7 = scmp.lt.s32.totalorder %s4790_s28, 5  ;;  %p4987_p8 = por %p5939_p5, %p252_p3 }
  0x2f   : > { %s4792_s8 = smov [#allocation5]   ;;  %p4047_p11 = scmp.lt.s32.totalorder %s4790_s28, 4 }
  0x30   : > { %s6004_s3 = scalar_select %p4987_p8, 1, 0 }
  0x31   : > { %p4991_p9 = pnand %p3570_p6, %p679_p7  ;;  %s711_s4 = sshll.u32 %s4792_s8, 4  ;;  %s712_s4 = int_to_ptr.vmem [resolvable:$true] %s711_s4 }
  0x32   : > { %6005 = sst [smem:[#allocation39_spill]] %s6004_s3  ;;  %s4999_s1 = sand.u32 1, %s4786_s27  }
  0x33   : > { %s6006_s25 = scalar_select %p4991_p9, 1, 0 }
  0x34   : > { %p3997_p10 = pneg %p4991_p9  ;;  %p5009_p13 = pnand %p4047_p11, %p4978_p4 }
  0x35   : > { %6007 = sst [smem:[#allocation40_spill]] %s6006_s25  ;;  %s5014_s0 = sand.u32 1, %s4790_s28  }
  0x36   : > { %p5003_p12 = pnand %p3997_p10, %p5939_p5  ;;  %s6010_s2 = sld [smem:[#allocation46_spill]] }
  0x37   : > { %s6009_s29 = scalar_select %p5009_p13, 1, 0 }
  0x38   : > { %s6008_s5 = scalar_select %p5003_p12, 1, 0 }
  0x39   : > { %p5024_p1 = pneg %p5003_p12 }
  0x3b   : > { %s6011_s9 = scalar_select %p5024_p1, 1, 0 }
  0x3c   : > { %s4284_s24 = scalar_lea.hbm %s6010_s2, 32 }
  0x3d   : > { %p4285_p0 = scmp.ne.s32.totalorder %s6010_s2, %s4284_s24  ;;  %p4291_p4 = scmp.lt.u32.totalorder %s4284_s24, %s6010_s2 }
  0x3f   : > { %p4287_p2 = pnand %p5024_p1, %p4285_p0 }
  0x41   : > { %p4288_p3 = pneg %p4287_p2 }
  0x43   : > { %p4293_p6 = pnand %p4291_p4, %p4288_p3 }
  0x45   : > { %4296 = shalt.err (!%p4293_p6)
}
  0x46   : > { %s4297_s7 = scalar_lea.vmem %s712_s4, 32  ;;  %p4305_p5 = scmp.lt.s32.totalorder %s712_s4, %s712_s4 }
  0x47   : > { %p4298_p7 = scmp.ne.s32.totalorder %s712_s4, %s4297_s7  ;;  %p4306_p8 = scmp.lt.s32.totalorder %s4297_s7, %s4297_s7 }
  0x49   : > { %p4300_p10 = pnand %p4298_p7, %p5024_p1  ;;  %p4307_p9 = por %p4306_p8, %p4305_p5 }
  0x4b   : > { %p4301_p11 = pneg %p4300_p10 }
  0x4d   : > { %p4308_p13 = pnand %p4307_p9, %p4301_p11 }
  0x4f   : > { %4311 = shalt.err (!%p4308_p13)
}
  0x50   : > { %4003 = dma.hbm_to_vmem [thread:$0]  (!%p5003_p12), %s6010_s2, 32, %s712_s4, [#allocation6]  }
  0x51   : > { %s5949_s22 = sshll.u32 %s4999_s1, 5  ;;  %s3778_s24 = sshll.u32 %s4790_s28, 9 }
  0x52   : > { %s6012_s10 = sld [smem:[#allocation49_spill]]  ;;  %s754_s3 = scalar_lea.vmem [#allocation8], %s5949_s22 }
  0x53   : > { %s761_s11 = sshll.u32 %s754_s3, 4  ;;  %s5054_s4 = scalar_lea.hbm %s5924_s18, %s3778_s24  ;;  %s5049_s11 = int_to_ptr.vmem [resolvable:$true] %s761_s11 }
  0x54   : > { %s5958_s2 = scalar_lea.sflag [#allocation9], %s5014_s0  ;;  %p6013_p8 = scmp.ne.s32.totalorder %s6009_s29, 0 }
  0x56   : > { %p5061_p9 = pneg %p6013_p8 }
  0x58   : > { %s5045_s7 = scalar_lea.hbm %s6012_s10, %s3778_s24  ;;  %s4317_s22 = scalar_lea.hbm %s6012_s10, 2048 }
  0x59   : > { %s4312_s6 = scalar_lea.hbm %s5045_s7, 512  ;;  %p4318_p2 = scmp.lt.u32.totalorder %s5045_s7, %s6012_s10 }
  0x5a   : > { %p4313_p5 = scmp.ne.s32.totalorder %s5045_s7, %s4312_s6  ;;  %p4319_p3 = scmp.lt.u32.totalorder %s4317_s22, %s4312_s6 }
  0x5b   : > { %s6014_s8 = scalar_select %p5061_p9, 1, 0 }
  0x5c   : > { %p4315_p13 = pnand %p5061_p9, %p4313_p5  ;;  %p4320_p4 = por %p4319_p3, %p4318_p2 }
  0x5d   : > { %p4321_p6 = scmp.lt.u32.totalorder %s4312_s6, %s5045_s7 }
  0x5e   : > { %p4316_p0 = pneg %p4315_p13 }
  0x5f   : > { %p4322_p7 = por %p4321_p6, %p4320_p4 }
  0x61   : > { %p4323_p10 = pnand %p4322_p7, %p4316_p0 }
  0x63   : > { %4326 = shalt.err (!%p4323_p10)
}
  0x64   : > { %s4327_s24 = scalar_lea.vmem %s5049_s11, 512  ;;  %s4793_s27 = smov [#allocation8]  }
  0x65   : > { %p4328_p11 = scmp.ne.s32.totalorder %s5049_s11, %s4327_s24  ;;  %s4332_s3 = sshll.u32 %s4793_s27, 4  ;;  %s4333_s3 = int_to_ptr.vmem [resolvable:$false] %s4332_s3 }
  0x66   : > { %s4334_s25 = scalar_lea.vmem %s4333_s3, 1024  ;;  %p4335_p12 = scmp.lt.s32.totalorder %s5049_s11, %s4333_s3 }
  0x67   : > { %p4330_p5 = pnand %p4328_p11, %p5061_p9  ;;  %p4336_p1 = scmp.lt.s32.totalorder %s4334_s25, %s4327_s24 }
  0x69   : > { %p4331_p13 = pneg %p4330_p5  ;;  %p4337_p2 = por %p4336_p1, %p4335_p12 }
  0x6b   : > { %p4338_p3 = pnand %p4337_p2, %p4331_p13 }
  0x6d   : > { %4341 = shalt.err (!%p4338_p3)
}
  0x6e   : > { %s5959_s6 = smov 128   ;;  %s5961_s22 = smov 8  }
  0x6f   : > { %4010 = dma.hbm_to_vmem [thread:$0]  (!%p6013_p8), %s5045_s7, 512, %s5049_s11, %s5958_s2, %s5959_s6, %s5959_s6, %s5961_s22  }
  0x70   : > { %s6015_s30 = sshll.u32 %s4999_s1, 5  ;;  %s5963_s27 = sshll.u32 %s4999_s1, 1 }
  0x71   : > { %s914_s26 = scalar_lea.vmem [#allocation19], %s6015_s30  ;;  %s3780_s3 = sshll.u32 %s4790_s28, 5 }
  0x72   : > { %s921_s24 = sshll.u32 %s914_s26, 4  ;;  %s6016_s13 = sld [smem:[#allocation54_spill]]  ;;  %s5091_s24 = int_to_ptr.vmem [resolvable:$true] %s921_s24 }
  0x73   : > { %s817_s20 = scalar_lea.vmem [#allocation11], %s5963_s27  ;;  %s5966_s11 = scalar_lea.sflag [#allocation12], %s5014_s0 }
  0x74   : > { %s825_s7 = sshll.u32 %s817_s20, 4  ;;  %s826_s7 = int_to_ptr.vmem [resolvable:$true] %s825_s7 }
  0x78   : > { %s5100_s23 = scalar_lea.hbm %s6016_s13, %s3780_s3  ;;  %s4347_s10 = scalar_lea.hbm %s6016_s13, 128 }
  0x79   : > { %s4342_s30 = scalar_lea.hbm %s5100_s23, 32  ;;  %p4348_p4 = scmp.lt.u32.totalorder %s5100_s23, %s6016_s13 }
  0x7a   : > { %p4343_p12 = scmp.ne.s32.totalorder %s5100_s23, %s4342_s30  ;;  %p4349_p6 = scmp.lt.u32.totalorder %s4347_s10, %s4342_s30 }
  0x7b   : > { %p4351_p10 = scmp.lt.u32.totalorder %s4342_s30, %s5100_s23 }
  0x7c   : > { %p4345_p1 = pnand %p4343_p12, %p5061_p9  ;;  %p4350_p7 = por %p4349_p6, %p4348_p4 }
  0x7e   : > { %p4346_p0 = pneg %p4345_p1  ;;  %p4352_p11 = por %p4351_p10, %p4350_p7 }
  0x80   : > { %p4353_p5 = pnand %p4352_p11, %p4346_p0 }
  0x82   : > { %4356 = shalt.err (!%p4353_p5)
}
  0x83   : > { %s4357_s20 = scalar_lea.vmem %s826_s7, 32  ;;  %s4796_s22 = smov [#allocation11]  }
  0x84   : > { %p4358_p13 = scmp.ne.s32.totalorder %s826_s7, %s4357_s20  ;;  %s4362_s27 = sshll.u32 %s4796_s22, 4  ;;  %s4363_s27 = int_to_ptr.vmem [resolvable:$false] %s4362_s27 }
  0x85   : > { %s4364_s2 = scalar_lea.vmem %s4363_s27, 64  ;;  %p4365_p12 = scmp.lt.s32.totalorder %s826_s7, %s4363_s27 }
  0x86   : > { %p4360_p2 = pnand %p4358_p13, %p5061_p9  ;;  %p4366_p1 = scmp.lt.s32.totalorder %s4364_s2, %s4357_s20 }
  0x88   : > { %p4361_p3 = pneg %p4360_p2  ;;  %p4367_p8 = por %p4366_p1, %p4365_p12 }
  0x8a   : > { %p4368_p4 = pnand %p4367_p8, %p4361_p3 }
  0x8c   : > { %4371 = shalt.err (!%p4368_p4)
}
  0x8d   : > { %p6017_p6 = scmp.ne.s32.totalorder %s6009_s29, 0  ;;  %s6018_s15 = sld [smem:[#allocation56_spill]] }
  0x8e   : > { %s6019_s27 = sshll.u32 %s4999_s1, 1  ;;  %s5965_s25 = scalar_lea.sflag [#allocation15], %s5014_s0 }
  0x8f   : > { %4016 = dma.hbm_to_vmem [thread:$0]  (!%p6017_p6), %s5100_s23, 32, %s826_s7, %s5966_s11  }
  0x90   : > { %s857_s26 = scalar_lea.vmem [#allocation14], %s6019_s27 }
  0x91   : > { %s865_s10 = sshll.u32 %s857_s26, 4  ;;  %s866_s10 = int_to_ptr.vmem [resolvable:$true] %s865_s10 }
  0x93   : > { %s5129_s30 = scalar_lea.hbm %s6018_s15, %s3780_s3  ;;  %s4377_s2 = scalar_lea.hbm %s6018_s15, 128 }
  0x94   : > { %s4372_s20 = scalar_lea.hbm %s5129_s30, 32  ;;  %p4378_p10 = scmp.lt.u32.totalorder %s5129_s30, %s6018_s15 }
  0x95   : > { %p4373_p8 = scmp.ne.s32.totalorder %s5129_s30, %s4372_s20  ;;  %p4379_p11 = scmp.lt.u32.totalorder %s4377_s2, %s4372_s20 }
  0x96   : > { %p4381_p13 = scmp.lt.u32.totalorder %s4372_s20, %s5129_s30 }
  0x97   : > { %p4375_p0 = pnand %p4373_p8, %p5061_p9  ;;  %p4380_p5 = por %p4379_p11, %p4378_p10 }
  0x99   : > { %p4376_p7 = pneg %p4375_p0  ;;  %p4382_p2 = por %p4381_p13, %p4380_p5 }
  0x9b   : > { %p4383_p3 = pnand %p4382_p2, %p4376_p7 }
  0x9d   : > { %4386 = shalt.err (!%p4383_p3)
}
  0x9e   : > { %s4387_s22 = scalar_lea.vmem %s866_s10, 32  ;;  %s4797_s27 = smov [#allocation14]  }
  0x9f   : > { %p4388_p12 = scmp.ne.s32.totalorder %s866_s10, %s4387_s22  ;;  %s4392_s26 = sshll.u32 %s4797_s27, 4  ;;  %s4393_s26 = int_to_ptr.vmem [resolvable:$false] %s4392_s26 }
  0xa0   : > { %s4394_s23 = scalar_lea.vmem %s4393_s26, 64  ;;  %p4395_p8 = scmp.lt.s32.totalorder %s866_s10, %s4393_s26 }
  0xa1   : > { %p4390_p1 = pnand %p4388_p12, %p5061_p9  ;;  %p4396_p0 = scmp.lt.s32.totalorder %s4394_s23, %s4387_s22 }
  0xa3   : > { %p4391_p4 = pneg %p4390_p1  ;;  %p4397_p6 = por %p4396_p0, %p4395_p8 }
  0xa5   : > { %p4398_p10 = pnand %p4397_p6, %p4391_p4 }
  0xa7   : > { %4401 = shalt.err (!%p4398_p10)
}
  0xa8   : > { %p6020_p11 = scmp.ne.s32.totalorder %s6009_s29, 0  ;;  %s5154_s20 = sshll.u32 %s4790_s28, 4 }
  0xa9   : > { %s896_s7 = scalar_lea.vmem [#allocation17], %s4999_s1  ;;  %s6021_s17 = sld [smem:[#allocation57_spill]] }
  0xaa   : > { %4022 = dma.hbm_to_vmem [thread:$0]  (!%p6020_p11), %s5129_s30, 32, %s866_s10, %s5965_s25  }
  0xab   : > { %s903_s2 = sshll.u32 %s896_s7, 4  ;;  %s5967_s27 = scalar_lea.sflag [#allocation18], %s5014_s0  ;;  %s904_s2 = int_to_ptr.vmem [resolvable:$true] %s903_s2 }
  0xaf   : > { %s5161_s22 = scalar_lea.hbm %s6021_s17, %s5154_s20  ;;  %s4407_s23 = scalar_lea.hbm %s6021_s17, 64 }
  0xb0   : > { %s4402_s26 = scalar_lea.hbm %s5161_s22, 16  ;;  %p4408_p13 = scmp.lt.u32.totalorder %s5161_s22, %s6021_s17 }
  0xb1   : > { %p4403_p6 = scmp.ne.s32.totalorder %s5161_s22, %s4402_s26  ;;  %p4409_p2 = scmp.lt.u32.totalorder %s4407_s23, %s4402_s26 }
  0xb2   : > { %p4411_p12 = scmp.lt.u32.totalorder %s4402_s26, %s5161_s22 }
  0xb3   : > { %p4405_p7 = pnand %p4403_p6, %p5061_p9  ;;  %p4410_p3 = por %p4409_p2, %p4408_p13 }
  0xb5   : > { %p4406_p5 = pneg %p4405_p7  ;;  %p4412_p1 = por %p4411_p12, %p4410_p3 }
  0xb7   : > { %p4413_p4 = pnand %p4412_p1, %p4406_p5 }
  0xb9   : > { %4416 = shalt.err (!%p4413_p4)
}
  0xba   : > { %s4417_s3 = scalar_lea.vmem %s904_s2, 16  ;;  %s4798_s6 = smov [#allocation17]  }
  0xbb   : > { %p4418_p8 = scmp.ne.s32.totalorder %s904_s2, %s4417_s3  ;;  %s4422_s11 = sshll.u32 %s4798_s6, 4  ;;  %s4423_s11 = int_to_ptr.vmem [resolvable:$false] %s4422_s11 }
  0xbc   : > { %s4424_s30 = scalar_lea.vmem %s4423_s11, 32  ;;  %p4425_p6 = scmp.lt.s32.totalorder %s904_s2, %s4423_s11 }
  0xbd   : > { %p4420_p0 = pnand %p4418_p8, %p5061_p9  ;;  %p4426_p7 = scmp.lt.s32.totalorder %s4424_s30, %s4417_s3 }
  0xbf   : > { %p4421_p10 = pneg %p4420_p0  ;;  %p4427_p11 = por %p4426_p7, %p4425_p6 }
  0xc1   : > { %p4428_p2 = pnand %p4427_p11, %p4421_p10 }
  0xc3   : > { %4431 = shalt.err (!%p4428_p2)
}
  0xc4   : > { %p6022_p13 = scmp.ne.s32.totalorder %s6009_s29, 0  ;;  %s5187_s10 = scalar_lea.hbm %s5925_s19, %s5154_s20 }
  0xc5   : > { %s934_s11 = scalar_lea.vmem [#allocation20], %s4999_s1  ;;  %s5968_s7 = scalar_lea.sflag [#allocation21], %s5014_s0 }
  0xc6   : > { %4028 = dma.hbm_to_vmem [thread:$0]  (!%p6022_p13), %s5161_s22, 16, %s904_s2, %s5967_s27  }
  0xc7   : > { %s941_s23 = sshll.u32 %s934_s11, 4  ;;  %s4432_s3 = scalar_lea.hbm %s5187_s10, 16  ;;  %s942_s23 = int_to_ptr.vmem [resolvable:$true] %s941_s23 }
  0xc8   : > { %p4433_p11 = scmp.ne.s32.totalorder %s5187_s10, %s4432_s3  ;;  %s4437_s22 = scalar_lea.hbm %s5925_s19, 64 }
  0xc9   : > { %p4438_p12 = scmp.lt.u32.totalorder %s5187_s10, %s5925_s19  ;;  %p4439_p1 = scmp.lt.u32.totalorder %s4437_s22, %s4432_s3 }
  0xca   : > { %p4435_p5 = pnand %p4433_p11, %p5061_p9  ;;  %p4441_p8 = scmp.lt.u32.totalorder %s4432_s3, %s5187_s10 }
  0xcb   : > { %p4440_p4 = por %p4439_p1, %p4438_p12 }
  0xcc   : > { %p4436_p3 = pneg %p4435_p5 }
  0xcd   : > { %p4442_p0 = por %p4441_p8, %p4440_p4 }
  0xcf   : > { %p4443_p10 = pnand %p4442_p0, %p4436_p3 }
  0xd1   : > { %4446 = shalt.err (!%p4443_p10)
}
  0xd2   : > { %s4447_s26 = scalar_lea.vmem %s942_s23, 16  ;;  %s4799_s11 = smov [#allocation20]  }
  0xd3   : > { %p4448_p6 = scmp.ne.s32.totalorder %s942_s23, %s4447_s26  ;;  %s4452_s27 = sshll.u32 %s4799_s11, 4  ;;  %s4453_s27 = int_to_ptr.vmem [resolvable:$false] %s4452_s27 }
  0xd4   : > { %s4454_s6 = scalar_lea.vmem %s4453_s27, 32  ;;  %p4455_p11 = scmp.lt.s32.totalorder %s942_s23, %s4453_s27 }
  0xd5   : > { %p4450_p7 = pnand %p4448_p6, %p5061_p9  ;;  %p4456_p5 = scmp.lt.s32.totalorder %s4454_s6, %s4447_s26 }
  0xd7   : > { %p4451_p2 = pneg %p4450_p7  ;;  %p4457_p13 = por %p4456_p5, %p4455_p11 }
  0xd9   : > { %p4458_p1 = pnand %p4457_p13, %p4451_p2 }
  0xdb   : > { %4461 = shalt.err (!%p4458_p1)
}
  0xdc   : > { %p6023_p12 = scmp.ne.s32.totalorder %s6009_s29, 0  ;;  %s3601_s3 = sshll.u32 %s4999_s1, 2 }
  0xdd   : > { %s3786_s2 = sshll.u32 %s4790_s28, 6  ;;  %s973_s25 = scalar_lea.vmem [#allocation23], %s3601_s3 }
  0xde   : > { %4034 = dma.hbm_to_vmem [thread:$0]  (!%p6023_p12), %s5187_s10, 16, %s942_s23, %s5968_s7  }
  0xdf   : > { %s5215_s27 = scalar_lea.hbm %s5927_s21, %s3786_s2  ;;  %s981_s26 = sshll.u32 %s973_s25, 4  ;;  %s5217_s26 = int_to_ptr.vmem [resolvable:$true] %s981_s26 }
  0xe0   : > { %s4800_s11 = smov [#allocation3]   ;;  %s5970_s13 = scalar_lea.sflag [#allocation24], %s5014_s0 }
  0xe1   : > { %s5219_s6 = sshll.u32 %s4800_s11, 4  ;;  %s4462_s10 = scalar_lea.hbm %s5215_s27, 64  ;;  %s698_s6 = int_to_ptr.vmem [resolvable:$true] %s5219_s6 }
  0xe2   : > { %p4463_p13 = scmp.ne.s32.totalorder %s5215_s27, %s4462_s10  ;;  %s4467_s22 = scalar_lea.hbm %s5927_s21, 256 }
  0xe3   : > { %p4468_p8 = scmp.lt.u32.totalorder %s5215_s27, %s5927_s21  ;;  %p4469_p0 = scmp.lt.u32.totalorder %s4467_s22, %s4462_s10 }
  0xe4   : > { %p4465_p3 = pnand %p4463_p13, %p5061_p9  ;;  %p4471_p6 = scmp.lt.u32.totalorder %s4462_s10, %s5215_s27 }
  0xe5   : > { %p4470_p10 = por %p4469_p0, %p4468_p8 }
  0xe6   : > { %p4466_p4 = pneg %p4465_p3 }
  0xe7   : > { %p4472_p7 = por %p4471_p6, %p4470_p10 }
  0xe9   : > { %p4473_p2 = pnand %p4472_p7, %p4466_p4 }
  0xeb   : > { %4476 = shalt.err (!%p4473_p2)
}
  0xec   : > { %s4477_s3 = scalar_lea.vmem %s5217_s26, 64  ;;  %s4801_s25 = smov [#allocation23]  }
  0xed   : > { %p4478_p11 = scmp.ne.s32.totalorder %s5217_s26, %s4477_s3  ;;  %s4482_s11 = sshll.u32 %s4801_s25, 4  ;;  %s4483_s11 = int_to_ptr.vmem [resolvable:$false] %s4482_s11 }
  0xee   : > { %s4484_s7 = scalar_lea.vmem %s4483_s11, 128  ;;  %p4485_p13 = scmp.lt.s32.totalorder %s5217_s26, %s4483_s11 }
  0xef   : > { %p4480_p5 = pnand %p4478_p11, %p5061_p9  ;;  %p4486_p3 = scmp.lt.s32.totalorder %s4484_s7, %s4477_s3 }
  0xf1   : > { %p4481_p1 = pneg %p4480_p5  ;;  %p4487_p8 = por %p4486_p3, %p4485_p13 }
  0xf3   : > { %p4488_p0 = pnand %p4487_p8, %p4481_p1 }
  0xf5   : > { %4491 = shalt.err (!%p4488_p0)
}
  0xf6   : > { %4040 = dma.hbm_to_vmem [thread:$0]  (!%p6023_p12), %s5215_s27, 64, %s5217_s26, %s5970_s13  }
  0xf7   : > { %s6024_s2 = sld [smem:[#allocation45_spill]]  ;;  %p6025_p10 = scmp.ne.s32.totalorder %s6011_s9, 0 }
  0xfd   : > { %s4492_s22 = scalar_lea.hbm %s6024_s2, 512 }
  0xfe   : > { %p4493_p4 = scmp.ne.s32.totalorder %s6024_s2, %s4492_s22  ;;  %p4499_p2 = scmp.lt.u32.totalorder %s4492_s22, %s6024_s2 }
 0x100   : > { %p4495_p6 = pnand %p4493_p4, %p6025_p10 }
 0x102   : > { %p4496_p7 = pneg %p4495_p6 }
 0x104   : > { %p4501_p11 = pnand %p4499_p2, %p4496_p7 }
 0x106   : > { %4504 = shalt.err (!%p4501_p11)
}
 0x107   : > { %s4505_s7 = scalar_lea.vmem %s698_s6, 512  ;;  %p4513_p3 = scmp.lt.s32.totalorder %s698_s6, %s698_s6 }
 0x108   : > { %p4506_p5 = scmp.ne.s32.totalorder %s698_s6, %s4505_s7  ;;  %p4514_p8 = scmp.lt.s32.totalorder %s4505_s7, %s4505_s7 }
 0x10a   : > { %p4508_p1 = pnand %p4506_p5, %p6025_p10  ;;  %p4515_p0 = por %p4514_p8, %p4513_p3 }
 0x10c   : > { %p4509_p13 = pneg %p4508_p1 }
 0x10e   : > { %p4516_p12 = pnand %p4515_p0, %p4509_p13 }
 0x110   : > { %4519 = shalt.err (!%p4516_p12)
}
 0x111   : > { %p6026_p4 = scmp.ne.s32.totalorder %s6008_s5, 0  ;;  %s6027_s27 = smov 8  }
 0x112   : > { %s6028_s26 = smov 128   ;;  %s4802_s22 = smov [#allocation7]  }
 0x113   : > { %4000 = dma.hbm_to_vmem [thread:$0]  (!%p6026_p4), %s6024_s2, 512, %s698_s6, [#allocation4], %s6028_s26, %s6028_s26, %s6027_s27  }
 0x114   : > { %s725_s30 = sshll.u32 %s4802_s22, 4  ;;  %s5268_s25 = sshll.u32 %s4999_s1, 7  ;;  %s726_s30 = int_to_ptr.vmem [resolvable:$true] %s725_s30 }
 0x115   : > { %s6029_s7 = sld [smem:[#allocation48_spill]] }
 0x11b   : > { %s4520_s13 = scalar_lea.hbm %s6029_s7, 16 }
 0x11c   : > { %p4521_p12 = scmp.ne.s32.totalorder %s6029_s7, %s4520_s13  ;;  %p4527_p2 = scmp.lt.u32.totalorder %s4520_s13, %s6029_s7 }
 0x11e   : > { %p4523_p6 = pnand %p4521_p12, %p6025_p10 }
 0x120   : > { %p4524_p7 = pneg %p4523_p6 }
 0x122   : > { %p4529_p11 = pnand %p4527_p2, %p4524_p7 }
 0x124   : > { %4532 = shalt.err (!%p4529_p11)
}
 0x125   : > { %s4533_s6 = scalar_lea.vmem %s726_s30, 16  ;;  %s4540_s22 = scalar_lea.vmem %s726_s30, 32 }
 0x126   : > { %p4534_p5 = scmp.ne.s32.totalorder %s726_s30, %s4533_s6  ;;  %p4541_p3 = scmp.lt.s32.totalorder %s726_s30, %s726_s30 }
 0x127   : > { %p4542_p8 = scmp.lt.s32.totalorder %s4540_s22, %s4533_s6 }
 0x128   : > { %p4536_p1 = pnand %p4534_p5, %p6025_p10 }
 0x129   : > { %p4543_p0 = por %p4542_p8, %p4541_p3 }
 0x12a   : > { %p4537_p13 = pneg %p4536_p1 }
 0x12c   : > { %p4544_p9 = pnand %p4543_p0, %p4537_p13 }
 0x12e   : > { %4547 = shalt.err (!%p4544_p9)
}
 0x12f   : > { %4006 = dma.hbm_to_vmem [thread:$0]  (!%p6026_p4), %s6029_s7, 16, %s726_s30, [#allocation6]  }
 0x130   : > { %s5289_s13 = sshll.u32 %s4790_s28, 11  ;;  %s796_s9 = scalar_lea.vmem [#allocation10], %s5268_s25 }
 0x131   : > { %s803_s3 = sshll.u32 %s796_s9, 4  ;;  %s6030_s12 = sld [smem:[#allocation53_spill]]  ;;  %s5298_s3 = int_to_ptr.vmem [resolvable:$true] %s803_s3 }
 0x132   : > { %p6031_p10 = scmp.ne.s32.totalorder %s6014_s8, 0 }
 0x137   : > { %s5296_s23 = scalar_lea.hbm %s6030_s12, %s5289_s13  ;;  %s4553_s22 = scalar_lea.hbm %s6030_s12, 8192 }
 0x138   : > { %s4548_s5 = scalar_lea.hbm %s5296_s23, 2048  ;;  %p4554_p6 = scmp.lt.u32.totalorder %s5296_s23, %s6030_s12 }
 0x139   : > { %p4549_p9 = scmp.ne.s32.totalorder %s5296_s23, %s4548_s5  ;;  %p4555_p7 = scmp.lt.u32.totalorder %s4553_s22, %s4548_s5 }
 0x13a   : > { %p4557_p11 = scmp.lt.u32.totalorder %s4548_s5, %s5296_s23 }
 0x13b   : > { %p4551_p4 = pnand %p4549_p9, %p6031_p10  ;;  %p4556_p2 = por %p4555_p7, %p4554_p6 }
 0x13d   : > { %p4552_p12 = pneg %p4551_p4  ;;  %p4558_p5 = por %p4557_p11, %p4556_p2 }
 0x13f   : > { %p4559_p1 = pnand %p4558_p5, %p4552_p12 }
 0x141   : > { %4562 = shalt.err (!%p4559_p1)
}
 0x142   : > { %s4563_s9 = scalar_lea.vmem %s5298_s3, 2048  ;;  %s4803_s11 = smov [#allocation10]  }
 0x143   : > { %p4564_p13 = scmp.ne.s32.totalorder %s5298_s3, %s4563_s9  ;;  %s4568_s10 = sshll.u32 %s4803_s11, 4  ;;  %s4569_s10 = int_to_ptr.vmem [resolvable:$false] %s4568_s10 }
 0x144   : > { %s4570_s30 = scalar_lea.vmem %s4569_s10, 4096  ;;  %p4571_p0 = scmp.lt.s32.totalorder %s5298_s3, %s4569_s10 }
 0x145   : > { %p4566_p3 = pnand %p4564_p13, %p6031_p10  ;;  %p4572_p9 = scmp.lt.s32.totalorder %s4570_s30, %s4563_s9 }
 0x147   : > { %p4567_p8 = pneg %p4566_p3  ;;  %p4573_p4 = por %p4572_p9, %p4571_p0 }
 0x149   : > { %p4574_p6 = pnand %p4573_p4, %p4567_p8 }
 0x14b   : > { %4577 = shalt.err (!%p4574_p6)
}
 0x14c   : > { %p6032_p12 = scmp.ne.s32.totalorder %s6009_s29, 0  ;;  %s6033_s5 = scalar_lea.sflag [#allocation9], %s5014_s0 }
 0x14d   : > { %s6034_s14 = sld [smem:[#allocation55_spill]]  ;;  %s836_s17 = scalar_lea.vmem [#allocation13], %s5268_s25 }
 0x14e   : > { %4013 = dma.hbm_to_vmem [thread:$0]  (!%p6032_p12), %s5296_s23, 2048, %s5298_s3, %s6033_s5, %s6028_s26, %s6028_s26, %s6027_s27  }
 0x14f   : > { %s843_s9 = sshll.u32 %s836_s17, 4  ;;  %s3590_s11 = sshll.u32 %s4999_s1, 6  ;;  %s5334_s9 = int_to_ptr.vmem [resolvable:$true] %s843_s9 }
 0x153   : > { %s5330_s15 = scalar_lea.hbm %s6034_s14, %s5289_s13  ;;  %s4583_s30 = scalar_lea.hbm %s6034_s14, 8192 }
 0x154   : > { %s4578_s10 = scalar_lea.hbm %s5330_s15, 2048  ;;  %p4584_p5 = scmp.lt.u32.totalorder %s5330_s15, %s6034_s14 }
 0x155   : > { %p4579_p7 = scmp.ne.s32.totalorder %s5330_s15, %s4578_s10  ;;  %p4585_p1 = scmp.lt.u32.totalorder %s4583_s30, %s4578_s10 }
 0x156   : > { %p4587_p3 = scmp.lt.u32.totalorder %s4578_s10, %s5330_s15 }
 0x157   : > { %p4581_p2 = pnand %p4579_p7, %p6031_p10  ;;  %p4586_p13 = por %p4585_p1, %p4584_p5 }
 0x159   : > { %p4582_p11 = pneg %p4581_p2  ;;  %p4588_p8 = por %p4587_p3, %p4586_p13 }
 0x15b   : > { %p4589_p0 = pnand %p4588_p8, %p4582_p11 }
 0x15d   : > { %4592 = shalt.err (!%p4589_p0)
}
 0x15e   : > { %s4593_s22 = scalar_lea.vmem %s5334_s9, 2048  ;;  %s4804_s17 = smov [#allocation13]  }
 0x15f   : > { %p4594_p9 = scmp.ne.s32.totalorder %s5334_s9, %s4593_s22  ;;  %s4598_s3 = sshll.u32 %s4804_s17, 4  ;;  %s4599_s3 = int_to_ptr.vmem [resolvable:$false] %s4598_s3 }
 0x160   : > { %s4600_s23 = scalar_lea.vmem %s4599_s3, 4096  ;;  %p4601_p7 = scmp.lt.s32.totalorder %s5334_s9, %s4599_s3 }
 0x161   : > { %p4596_p4 = pnand %p4594_p9, %p6031_p10  ;;  %p4602_p2 = scmp.lt.s32.totalorder %s4600_s23, %s4593_s22 }
 0x163   : > { %p4597_p6 = pneg %p4596_p4  ;;  %p4603_p5 = por %p4602_p2, %p4601_p7 }
 0x165   : > { %p4604_p1 = pnand %p4603_p5, %p4597_p6 }
 0x167   : > { %4607 = shalt.err (!%p4604_p1)
}
 0x168   : > { %s6035_s10 = scalar_lea.sflag [#allocation12], %s5014_s0  ;;  %s3783_s30 = sshll.u32 %s4790_s28, 10 }
 0x169   : > { %4019 = dma.hbm_to_vmem [thread:$0]  (!%p6032_p12), %s5330_s15, 2048, %s5334_s9, %s6035_s10, %s6028_s26, %s6028_s26, %s6027_s27  }
 0x16a   : > { %s876_s5 = scalar_lea.vmem [#allocation16], %s3590_s11  ;;  %s5368_s3 = scalar_lea.hbm %s5922_s16, %s3783_s30 }
 0x16b   : > { %s883_s6 = sshll.u32 %s876_s5, 4  ;;  %s4608_s23 = scalar_lea.hbm %s5368_s3, 1024  ;;  %s5370_s6 = int_to_ptr.vmem [resolvable:$true] %s883_s6 }
 0x16c   : > { %p4609_p11 = scmp.ne.s32.totalorder %s5368_s3, %s4608_s23  ;;  %s4613_s26 = scalar_lea.hbm %s5922_s16, 4096 }
 0x16d   : > { %p4614_p8 = scmp.lt.u32.totalorder %s5368_s3, %s5922_s16  ;;  %p4615_p0 = scmp.lt.u32.totalorder %s4613_s26, %s4608_s23 }
 0x16e   : > { %p4611_p13 = pnand %p4609_p11, %p6031_p10  ;;  %p4617_p4 = scmp.lt.u32.totalorder %s4608_s23, %s5368_s3 }
 0x16f   : > { %p4616_p9 = por %p4615_p0, %p4614_p8 }
 0x170   : > { %p4612_p3 = pneg %p4611_p13 }
 0x171   : > { %p4618_p6 = por %p4617_p4, %p4616_p9 }
 0x173   : > { %p4619_p7 = pnand %p4618_p6, %p4612_p3 }
 0x175   : > { %4622 = shalt.err (!%p4619_p7)
}
 0x176   : > { %s4623_s11 = scalar_lea.vmem %s5370_s6, 1024  ;;  %s4805_s10 = smov [#allocation16]  }
 0x177   : > { %p4624_p2 = scmp.ne.s32.totalorder %s5370_s6, %s4623_s11  ;;  %s4628_s30 = sshll.u32 %s4805_s10, 4  ;;  %s4629_s30 = int_to_ptr.vmem [resolvable:$false] %s4628_s30 }
 0x178   : > { %s4630_s5 = scalar_lea.vmem %s4629_s30, 2048  ;;  %p4631_p11 = scmp.lt.s32.totalorder %s5370_s6, %s4629_s30 }
 0x179   : > { %p4626_p5 = pnand %p4624_p2, %p6031_p10  ;;  %p4632_p13 = scmp.lt.s32.totalorder %s4630_s5, %s4623_s11 }
 0x17b   : > { %p4627_p1 = pneg %p4626_p5  ;;  %p4633_p8 = por %p4632_p13, %p4631_p11 }
 0x17d   : > { %p4634_p0 = pnand %p4633_p8, %p4627_p1 }
 0x17f   : > { %4637 = shalt.err (!%p4634_p0)
}
 0x180   : > { %s4806_s22 = smov 64   ;;  %s4807_s17 = smov 4  }
 0x181   : > { %s6036_s23 = scalar_lea.sflag [#allocation15], %s5014_s0  ;;  %s4638_s28 = scalar_lea.hbm %s5054_s4, 512 }
 0x182   : > { %4025 = dma.hbm_to_vmem [thread:$0]  (!%p6032_p12), %s5368_s3, 1024, %s5370_s6, %s6036_s23, %s4806_s22, %s4806_s22, %s4807_s17  }
 0x183   : > { %p4639_p3 = scmp.ne.s32.totalorder %s5054_s4, %s4638_s28  ;;  %s4643_s15 = scalar_lea.hbm %s5924_s18, 2048 }
 0x184   : > { %p4644_p6 = scmp.lt.u32.totalorder %s5054_s4, %s5924_s18  ;;  %p4645_p7 = scmp.lt.u32.totalorder %s4643_s15, %s4638_s28 }
 0x185   : > { %p4641_p9 = pnand %p4639_p3, %p6031_p10  ;;  %p4647_p5 = scmp.lt.u32.totalorder %s4638_s28, %s5054_s4 }
 0x186   : > { %p4646_p2 = por %p4645_p7, %p4644_p6 }
 0x187   : > { %p4642_p4 = pneg %p4641_p9 }
 0x188   : > { %p4648_p1 = por %p4647_p5, %p4646_p2 }
 0x18a   : > { %p4649_p11 = pnand %p4648_p1, %p4642_p4 }
 0x18c   : > { %4652 = shalt.err (!%p4649_p11)
}
 0x18d   : > { %s4653_s6 = scalar_lea.vmem %s5091_s24, 512  ;;  %s4808_s3 = smov [#allocation19]  }
 0x18e   : > { %p4654_p13 = scmp.ne.s32.totalorder %s5091_s24, %s4653_s6  ;;  %s4658_s10 = sshll.u32 %s4808_s3, 4  ;;  %s4659_s10 = int_to_ptr.vmem [resolvable:$false] %s4658_s10 }
 0x18f   : > { %s4660_s30 = scalar_lea.vmem %s4659_s10, 1024  ;;  %p4661_p3 = scmp.lt.s32.totalorder %s5091_s24, %s4659_s10 }
 0x190   : > { %p4656_p8 = pnand %p4654_p13, %p6031_p10  ;;  %p4662_p9 = scmp.lt.s32.totalorder %s4660_s30, %s4653_s6 }
 0x192   : > { %p4657_p0 = pneg %p4656_p8  ;;  %p4663_p6 = por %p4662_p9, %p4661_p3 }
 0x194   : > { %p4664_p7 = pnand %p4663_p6, %p4657_p0 }
 0x196   : > { %4667 = shalt.err (!%p4664_p7)
}
 0x197   : > { %s6037_s5 = scalar_lea.sflag [#allocation18], %s5014_s0  ;;  %s6038_s27 = sld [smem:[#allocation58_spill]] }
 0x198   : > { %4031 = dma.hbm_to_vmem [thread:$0]  (!%p6032_p12), %s5054_s4, 512, %s5091_s24, %s6037_s5, %s4806_s22, %s4806_s22, %s4807_s17  }
 0x199   : > { %s952_s9 = scalar_lea.vmem [#allocation22], %s5268_s25 }
 0x19a   : > { %s959_s11 = sshll.u32 %s952_s9, 4  ;;  %s5431_s11 = int_to_ptr.vmem [resolvable:$true] %s959_s11 }
 0x19d   : > { %s6039_s15 = smov %s6038_s27  ;;  %s5428_s26 = scalar_lea.hbm %s6038_s27, %s5289_s13 }
 0x19e   : > { %s4668_s6 = scalar_lea.hbm %s5428_s26, 2048  ;;  %s4673_s24 = scalar_lea.hbm %s6039_s15, 8192 }
 0x19f   : > { %p4669_p4 = scmp.ne.s32.totalorder %s5428_s26, %s4668_s6  ;;  %p4674_p1 = scmp.lt.u32.totalorder %s5428_s26, %s6039_s15 }
 0x1a0   : > { %p4675_p11 = scmp.lt.u32.totalorder %s4673_s24, %s4668_s6  ;;  %p4677_p8 = scmp.lt.u32.totalorder %s4668_s6, %s5428_s26 }
 0x1a1   : > { %p4671_p2 = pnand %p4669_p4, %p6031_p10 }
 0x1a2   : > { %p4676_p13 = por %p4675_p11, %p4674_p1 }
 0x1a3   : > { %p4672_p5 = pneg %p4671_p2 }
 0x1a4   : > { %p4678_p0 = por %p4677_p8, %p4676_p13 }
 0x1a6   : > { %p4679_p3 = pnand %p4678_p0, %p4672_p5 }
 0x1a8   : > { %4682 = shalt.err (!%p4679_p3)
}
 0x1a9   : > { %s4683_s25 = scalar_lea.vmem %s5431_s11, 2048  ;;  %s4809_s17 = smov [#allocation22]  }
 0x1aa   : > { %p4684_p9 = scmp.ne.s32.totalorder %s5431_s11, %s4683_s25  ;;  %s4688_s10 = sshll.u32 %s4809_s17, 4  ;;  %s4689_s10 = int_to_ptr.vmem [resolvable:$false] %s4688_s10 }
 0x1ab   : > { %s4690_s30 = scalar_lea.vmem %s4689_s10, 4096  ;;  %p4691_p4 = scmp.lt.s32.totalorder %s5431_s11, %s4689_s10 }
 0x1ac   : > { %p4686_p6 = pnand %p4684_p9, %p6031_p10  ;;  %p4692_p2 = scmp.lt.s32.totalorder %s4690_s30, %s4683_s25 }
 0x1ae   : > { %p4687_p7 = pneg %p4686_p6  ;;  %p4693_p1 = por %p4692_p2, %p4691_p4 }
 0x1b0   : > { %p4694_p11 = pnand %p4693_p1, %p4687_p7 }
 0x1b2   : > { %4697 = shalt.err (!%p4694_p11)
}
 0x1b3   : > { %s4810_s5 = smov 256   ;;  %s4811_s23 = smov 16  }
 0x1b4   : > { %s6040_s28 = scalar_lea.sflag [#allocation21], %s5014_s0  ;;  %s6041_s6 = sld [smem:[#allocation60_spill]] }
 0x1b5   : > { %4037 = dma.hbm_to_vmem [thread:$0]  (!%p6032_p12), %s5428_s26, 2048, %s5431_s11, %s6040_s28, %s4810_s5, %s4810_s5, %s4811_s23  }
 0x1b6   : > { %s999_s4 = scalar_lea.vmem [#allocation25], %s4999_s1 }
 0x1b7   : > { %s1006_s24 = sshll.u32 %s999_s4, 4  ;;  %s1007_s24 = int_to_ptr.vmem [resolvable:$true] %s1006_s24 }
 0x1ba   : > { %s5460_s3 = scalar_lea.hbm %s6041_s6, %s5154_s20  ;;  %s4703_s26 = scalar_lea.hbm %s6041_s6, 64 }
 0x1bb   : > { %s4698_s22 = scalar_lea.hbm %s5460_s3, 16  ;;  %p4704_p0 = scmp.lt.u32.totalorder %s5460_s3, %s6041_s6 }
 0x1bc   : > { %p4699_p5 = scmp.ne.s32.totalorder %s5460_s3, %s4698_s22  ;;  %p4705_p3 = scmp.lt.u32.totalorder %s4703_s26, %s4698_s22 }
 0x1bd   : > { %p4707_p6 = scmp.lt.u32.totalorder %s4698_s22, %s5460_s3 }
 0x1be   : > { %p4701_p13 = pnand %p4699_p5, %p6031_p10  ;;  %p4706_p9 = por %p4705_p3, %p4704_p0 }
 0x1c0   : > { %p4702_p8 = pneg %p4701_p13  ;;  %p4708_p7 = por %p4707_p6, %p4706_p9 }
 0x1c2   : > { %p4709_p4 = pnand %p4708_p7, %p4702_p8 }
 0x1c4   : > { %4712 = shalt.err (!%p4709_p4)
}
 0x1c5   : > { %s4713_s1 = scalar_lea.vmem %s1007_s24, 16  ;;  %s4812_s20 = smov [#allocation25]  }
 0x1c6   : > { %p4714_p2 = scmp.ne.s32.totalorder %s1007_s24, %s4713_s1  ;;  %s4718_s10 = sshll.u32 %s4812_s20, 4  ;;  %s4719_s10 = int_to_ptr.vmem [resolvable:$false] %s4718_s10 }
 0x1c7   : > { %s4720_s30 = scalar_lea.vmem %s4719_s10, 32  ;;  %p4721_p5 = scmp.lt.s32.totalorder %s1007_s24, %s4719_s10 }
 0x1c8   : > { %p4716_p1 = pnand %p4714_p2, %p6031_p10  ;;  %p4722_p13 = scmp.lt.s32.totalorder %s4720_s30, %s4713_s1 }
 0x1ca   : > { %p4717_p11 = pneg %p4716_p1  ;;  %p4723_p12 = por %p4722_p13, %p4721_p5 }
 0x1cc   : > { %p4724_p0 = pnand %p4723_p12, %p4717_p11 }
 0x1ce   : > { %4727 = shalt.err (!%p4724_p0)
}
 0x1cf   : > { %p6042_p3 = scmp.ne.s32.totalorder %s6009_s29, 0  ;;  %s6043_s5 = scalar_lea.sflag [#allocation24], %s5014_s0 }
 0x1d0   : > { %s6044_s23 = sld [smem:[#allocation40_spill]] }
 0x1d1   : > { %4043 = dma.hbm_to_vmem [thread:$0]  (!%p6042_p3), %s5460_s3, 16, %s1007_s24, %s6043_s5  }
 0x1d6   : > { %p6045_p8 = scmp.ne.s32.totalorder %s6044_s23, 0 }
 0x1d7   : > { %s6046_s8 = sld [smem:[#allocation36_spill]] (!%p6045_p8) }
 0x1d8   : > { %1015 = sbr.rel (%p6045_p8) target bundleno = 2687 (0xa7f), region = 116 }
 0x1dd   : > { %p6047_p10 = scmp.eq.s32.totalorder (!%p6045_p8), %s6046_s8, 0 }
 0x1df   : > { %4745 = dma.done.wait (%p6047_p10), [#allocation4], 512   ;;  %p6048_p9 = pmov %p6047_p10 }
 0x1e1   : > { %4747 = vsyncadd (%p6048_p9), [#allocation4], 4294966784  ;;  %p6049_p6 = pmov %p6048_p9 }
 0x1e3   : > { %4749 = dma.done.wait (%p6049_p6), [#allocation6], 48   ;;  %p6050_p12 = pmov %p6049_p6 }
 0x1e4   : > { %s6051_s29 = sld [smem:[#allocation34_spill]]  ;;  %s6052_s0 = sld [smem:[#allocation39_spill]] }
 0x1e5   : > { %4751 = vsyncadd (%p6050_p12), [#allocation6], 4294967248  ;;  %s5493_s28 = sand.u32 1, %s6046_s8  }
 0x1e6   : > { %s1030_s3 = scalar_lea.sflag [#allocation9], %s5493_s28 }
 0x1ea   : > { %s5496_s27 = sand.u32 1, %s6051_s29   ;;  %p6053_p7 = scmp.ne.s32.totalorder %s6052_s0, 0 }
 0x1eb   : > { %s3609_s9 = sshll.u32 %s5496_s27, 5 }
 0x1ec   : > { %s5500_s4 = scalar_lea.vmem [#allocation8], %s3609_s9 }
 0x1ed   : > { %4753 = dma.done.wait (%p6053_p7), %s1030_s3, 2560  }
 0x1ee   : > { %4755 = vsyncadd (%p6053_p7), %s1030_s3, 4294964736  ;;  %s3610_s24 = sshll.u32 %s5496_s27, 7  ;;  %s3611_s22 = sshll.u32 %s5496_s27, 1 }
 0x1ef   : > { %s5508_s13 = scalar_lea.vmem [#allocation10], %s3610_s24  ;;  %s1048_s25 = scalar_lea.sflag [#allocation12], %s5493_s28 }
 0x1f0   : > { %s5511_s26 = scalar_lea.vmem [#allocation11], %s3611_s22 }
 0x1f1   : > { %4757 = dma.done.wait (%p6053_p7), %s1048_s25, 2080  }
 0x1f2   : > { %4759 = vsyncadd (%p6053_p7), %s1048_s25, 4294965216  ;;  %s5517_s11 = scalar_lea.vmem [#allocation13], %s3610_s24  ;;  %s1066_s17 = scalar_lea.sflag [#allocation15], %s5493_s28 }
 0x1f3   : > { %s5520_s1 = scalar_lea.vmem [#allocation14], %s3611_s22 }
 0x1f4   : > { %4761 = dma.done.wait (%p6053_p7), %s1066_s17, 1056  }
 0x1f5   : > { %4763 = vsyncadd (%p6053_p7), %s1066_s17, 4294966240  ;;  %s3614_s20 = sshll.u32 %s5496_s27, 6  ;;  %s1084_s30 = scalar_lea.sflag [#allocation18], %s5493_s28 }
 0x1f6   : > { %s5527_s10 = scalar_lea.vmem [#allocation16], %s3614_s20 }
 0x1f7   : > { %4765 = dma.done.wait (%p6053_p7), %s1084_s30, 528  }
 0x1f8   : > { %4767 = vsyncadd (%p6053_p7), %s1084_s30, 4294966768  ;;  %s5535_s23 = scalar_lea.vmem [#allocation19], %s3609_s9  ;;  %s1101_s29 = scalar_lea.sflag [#allocation21], %s5493_s28 }
 0x1f9   : > { %4769 = dma.done.wait (%p6053_p7), %s1101_s29, 2064  }
 0x1fa   : > { %4771 = vsyncadd (%p6053_p7), %s1101_s29, 4294965232  ;;  %s3617_s22 = sshll.u32 %s5496_s27, 2  ;;  %s5544_s25 = scalar_lea.vmem [#allocation22], %s3610_s24 }
 0x1fb   : > { %s1118_s17 = scalar_lea.sflag [#allocation24], %s5493_s28  ;;  %s5547_s20 = scalar_lea.vmem [#allocation23], %s3617_s22 }
 0x1fc   : > { %4773 = dma.done.wait (%p6053_p7), %s1118_s17, 80  }
 0x1fd   : > { %4775 = vsyncadd (%p6053_p7), %s1118_s17, 4294967216  ;;  %v4813_v0 = vmov 0   ;;  %p1271_p4 = scmp.lt.s32.totalorder %s6046_s8, 3  ;;  %v4108_v1 = vld [vmem:[#allocation3 + $0x4] ss:$8 sps:$4 sm:$0xff]   ;;  %s6054_s9 = sld [smem:[#allocation41_spill]]  ;;  %v1310_v45 = vlaneseq }
 0x1fe   : > { %1376 = vmatprep.mubr.bf16.mxu0 %v4813_v0  ;;  %v4110_v2 = vld [vmem:[#allocation3] ss:$8 sps:$4 sm:$0xff]   ;;  %1344 = vmatprep.subr.bf16.mxu0 %v4108_v1  ;;  %v4111_v3 = vld [vmem:[#allocation3 + $0x14] ss:$8 sps:$4 sm:$0xff]   ;;  %v4113_v4 = vld [vmem:[#allocation3 + $0x10] ss:$8 sps:$4 sm:$0xff]  }
 0x1ff   : > { %s6071_s8 = smov (!%p1271_p4, %s6046_s8), 3  ;;  %1345 = vmatpush1.bf16.msra.mxu0 %v4110_v2  ;;  %v4116_v6 = vld [vmem:[%s5500_s4 + $0x4] ss:$8 sps:$4 sm:$0xff]   ;;  %v4114_v7 = vld [vmem:[%s5500_s4] ss:$8 sps:$4 sm:$0xff]   ;;  %s6055_s17 = sld [smem:[#allocation47_spill]] }
 0x200   : > { %1346 = vmatprep.subr.bf16.mxu0 %v4111_v3  ;;  %s5564_s24 = sshll.u32 %s6071_s8, 1  ;;  %v4119_v9 = vld [vmem:[%s5500_s4 + $0x14] ss:$8 sps:$4 sm:$0xff]   ;;  %s3787_s30 = sshll.u32 %s6071_s8, 7  ;;  %vm1340_vm0 = vcmask 261120   ;;  %v5651_v46 = vshrl.u32 %v1310_v45, 7 }
 0x201   : > { %v4117_v13 = vld [vmem:[%s5500_s4 + $0x10] ss:$8 sps:$4 sm:$0xff]   ;;  %s6057_s22 = sld [smem:[#allocation51_spill]]  ;;  %s3788_s6 = sshll.u32 %s6071_s8, 8  ;;  %v1308_v48 = vld [vmem:[#allocation5] sm:$0x3] }
 0x202   : > { %v5654_v47 = vsub.s32 0, %v5651_v46  ;;  %v5657_v49 = vsub.s32 1, %v5651_v46  ;;  %s6060_s29 = sld [smem:[#allocation52_spill]]  ;;  %s6061_s0 = sld [smem:[#allocation42_spill]]  ;;  %vm1842_vm1 = vcmask 523264   ;;  %vm1844_vm2 = vcmask 785408  }
 0x203   : > { %v1302_v5 = vld [vmem:[%s6054_s9] sm:$0x3]  ;;  %1347 = vmatpush1.bf16.msra.mxu0 %v4113_v4  ;;  %s6056_s9 = sld [smem:[#allocation43_spill]]  ;;  %vm1859_vm3 = vcmask 1041408   ;;  %vm2016_vm4 = vcmask 1043456   ;;  %vm4818_vm5 = vmmov 0  }
 0x204   : > { %v1307_v8 = vpack.c.bf16 %v1302_v5, %v1302_v5  ;;  %1606 = vmatprep.subr.bf16.mxu0 %v4116_v6  ;;  %v1313_v50 = vrot.slane %v1308_v48, %v5654_v47  ;;  %v1317_v51 = vrot.slane %v1308_v48, %v5657_v49 }
 0x205   : > { %v4120_v10 = vld [vmem:[%s6055_s17 + $0x40] sm:$0xff]   ;;  %v4122_v12 = vld [vmem:[%s6055_s17 + $0x48] sm:$0xff]   ;;  %v4124_v15 = vld [vmem:[%s6055_s17 + $0x50] sm:$0xff]  }
 0x206   : > { %v4121_v11 = vld [vmem:[%s6055_s17] sm:$0xff]   ;;  %3790 = vmatprep.subr.bf16.mxu1 %v4120_v10  ;;  %v4123_v14 = vld [vmem:[%s6055_s17 + $0x8] sm:$0xff]   ;;  %3631 = vmatmul.mubr.msk.bf16.vlgmr.msra.gmra.mrb[0].mxu0 %vm1340_vm0, %v1307_v8  ;;  %v4126_v18 = vld [vmem:[%s6055_s17 + $0x10] sm:$0xff]  }
 0x207   : > { %s5585_s14 = scalar_lea.vmem %s6057_s22, %s3787_s30  ;;  %3791 = vmatpush3.bf16.msra.mxu1 %v4121_v11  ;;  %1607 = vmatpush1.bf16.msra.mxu0 %v4114_v7  ;;  %v4128_v20 = vld [vmem:[%s6055_s17 + $0x58] sm:$0xff]   ;;  %v4132_v24 = vld [vmem:[%s6055_s17 + $0x60] sm:$0xff]   ;;  %v4136_v28 = vld [vmem:[%s6055_s17 + $0x68] sm:$0xff]   ;;  %s6059_s30 = sld [smem:[#allocation50_spill]] }
 0x208   : > { %3792 = vmatprep.subr.bf16.mxu1 %v4122_v12  ;;  %1638 = vmatprep.mubr.bf16.mxu0 %v4813_v0  ;;  %v4125_v17 = vld [vmem:[%s5585_s14 + $0x40] sm:$0xff]   ;;  %v4129_v22 = vld [vmem:[%s5585_s14 + $0x48] sm:$0xff]   ;;  %v4130_v23 = vld [vmem:[%s6055_s17 + $0x18] sm:$0xff]   ;;  %s1290_s22 = scalar_lea.vmem %s6060_s29, %s6071_s8 }
 0x209   : > { %s1274_s2 = scalar_lea.vmem %s6056_s9, %s5564_s24  ;;  %1608 = vmatprep.subr.bf16.mxu0 %v4119_v9  ;;  %v4127_v21 = vld [vmem:[%s5585_s14] sm:$0xff]   ;;  %v4131_v25 = vld [vmem:[%s5585_s14 + $0x8] sm:$0xff]   ;;  %v4133_v26 = vld [vmem:[%s5585_s14 + $0x50] sm:$0xff]  }
 0x20a   : > { %v1565_v16 = vld [vmem:[%s1274_s2] sm:$0x3]  ;;  %v4135_v29 = vld [vmem:[%s5585_s14 + $0x10] sm:$0xff]   ;;  %v4137_v30 = vld [vmem:[%s5585_s14 + $0x58] sm:$0xff]   ;;  %s6058_s2 = sld [smem:[#allocation59_spill]] }
 0x20b   : > { %3793 = vmatpush3.bf16.msra.mxu1 %v4123_v14  ;;  %v1570_v19 = vpack.c.bf16 %v1565_v16, %v1565_v16  ;;  %1609 = vmatpush1.bf16.msra.mxu0 %v4117_v13  ;;  %v4134_v27 = vld [vmem:[%s6055_s17 + $0x20] sm:$0xff]   ;;  %v4138_v31 = vld [vmem:[%s6055_s17 + $0x28] sm:$0xff]   ;;  %v4139_v32 = vld [vmem:[%s5585_s14 + $0x18] sm:$0xff]  }
 0x20c   : > { %3794 = vmatprep.subr.bf16.mxu1 %v4124_v15  ;;  %3812 = vmatprep.subr.bf16.mxu0 %v4125_v17  ;;  %v4140_v33 = vld [vmem:[%s6055_s17 + $0x70] sm:$0xff]   ;;  %v4141_v34 = vld [vmem:[%s5585_s14 + $0x60] sm:$0xff]   ;;  %v4144_v37 = vld [vmem:[%s6055_s17 + $0x78] sm:$0xff]  }
 0x20d   : > { %v4142_v35 = vld [vmem:[%s6055_s17 + $0x30] sm:$0xff]   ;;  %v4143_v36 = vld [vmem:[%s5585_s14 + $0x20] sm:$0xff]   ;;  %v4145_v38 = vld [vmem:[%s5585_s14 + $0x68] sm:$0xff]  }
 0x20e   : > { %3653 = vmatmul.mubr.msk.bf16.vlgmr.msra.gmra.mrb[4].mxu0 %vm1340_vm0, %v1570_v19  ;;  %v4146_v39 = vld [vmem:[%s6055_s17 + $0x38] sm:$0xff]   ;;  %v4147_v40 = vld [vmem:[%s5585_s14 + $0x28] sm:$0xff]   ;;  %v4148_v41 = vld [vmem:[%s5585_s14 + $0x70] sm:$0xff]  }
 0x20f   : > { %3795 = vmatpush3.bf16.msra.mxu1 %v4126_v18  ;;  %3813 = vmatpush3.bf16.msra.mxu0 %v4127_v21  ;;  %v4149_v42 = vld [vmem:[%s5585_s14 + $0x30] sm:$0xff]   ;;  %v4150_v43 = vld [vmem:[%s5585_s14 + $0x78] sm:$0xff]   ;;  %v4152_v12 = vld [vmem:[%s5508_s13] ss:$8 sps:$4 sm:$0xff]  }
 0x210   : > { %3796 = vmatprep.subr.bf16.mxu1 %v4128_v20  ;;  %3814 = vmatprep.subr.bf16.mxu0 %v4129_v22  ;;  %s5629_s28 = scalar_lea.vmem %s6058_s2, %s3788_s6  ;;  %v4151_v44 = vld [vmem:[%s5585_s14 + $0x38] sm:$0xff]   ;;  %s1282_s14 = scalar_lea.vmem %s6059_s30, %s5564_s24  ;;  %v4154_v13 = vld [vmem:[%s5508_s13 + $0x4] ss:$8 sps:$4 sm:$0xff]   ;;  %v4158_v17 = vld [vmem:[%s5508_s13 + $0x20] ss:$8 sps:$4 sm:$0xff]  }
 0x211   : > { %v1571_v57 = vld [vmem:[%s1282_s14] sm:$0x3]  ;;  %v4155_v15 = vld [vmem:[%s5508_s13 + $0x10] ss:$8 sps:$4 sm:$0xff]   ;;  %v4160_v16 = vld [vmem:[%s5508_s13 + $0x24] ss:$8 sps:$4 sm:$0xff]  }
 0x212   : > { %v1576_v61 = vrot.slane %v1571_v57, %v5654_v47  ;;  %v1580_v63 = vrot.slane %v1571_v57, %v5657_v49  ;;  %v4157_v14 = vld [vmem:[%s5508_s13 + $0x14] ss:$8 sps:$4 sm:$0xff]   ;;  %v4161_v19 = vld [vmem:[%s5508_s13 + $0x30] ss:$8 sps:$4 sm:$0xff]   ;;  %v4166_v22 = vld [vmem:[%s5508_s13 + $0x44] ss:$8 sps:$4 sm:$0xff]  }
 0x213   : > { %3797 = vmatpush3.bf16.msra.mxu1 %v4130_v23  ;;  %3815 = vmatpush3.bf16.msra.mxu0 %v4131_v25  ;;  %v4163_v18 = vld [vmem:[%s5508_s13 + $0x34] ss:$8 sps:$4 sm:$0xff]   ;;  %v4164_v25 = vld [vmem:[%s5508_s13 + $0x40] ss:$8 sps:$4 sm:$0xff]   ;;  %s6062_s6 = sld [smem:[#allocation44_spill]]  ;;  %s4814_s30 = smov 64  }
 0x214   : > { %3798 = vmatprep.subr.bf16.mxu1 %v4132_v24  ;;  %3816 = vmatprep.subr.bf16.mxu0 %v4133_v26  ;;  %s4815_s14 = smov 32   ;;  %v4187_v57 = vld [vmem:[%s5517_s11 + $0x34] ss:$8 sps:$4 sm:$0xff]  }
 0x217   : > { %3799 = vmatpush3.bf16.msra.mxu1 %v4134_v27  ;;  %3817 = vmatpush3.bf16.msra.mxu0 %v4135_v29  ;;  %v4169_v27 = vld [vmem:[%s5508_s13 + $0x54] ss:$8 sps:$4 sm:$0xff]  }
 0x218   : > { %3800 = vmatprep.subr.bf16.mxu1 %v4136_v28  ;;  %3818 = vmatprep.subr.bf16.mxu0 %v4137_v30  ;;  %v4167_v28 = vld [vmem:[%s5508_s13 + $0x50] ss:$8 sps:$4 sm:$0xff]   ;;  %v3632_v29 = vld [vmem:[#allocation7] ss:$0 sm:$0xff] }
 0x219   : > { %s1278_s4 = scalar_lea.vmem %s6062_s6, %s5564_s24 }
 0x21a   : > { %v1828_v48 = vld [vmem:[%s1278_s4] sm:$0x3] }
 0x21b   : > { %3801 = vmatpush3.bf16.msra.mxu1 %v4138_v31  ;;  %3819 = vmatpush3.bf16.msra.mxu0 %v4139_v32  ;;  %v3654_v32 = vld [vmem:[%s1290_s22] ss:$0 sm:$0xff] }
 0x21c   : > { %3802 = vmatprep.subr.bf16.mxu1 %v4140_v33  ;;  %3820 = vmatprep.subr.bf16.mxu0 %v4141_v34  ;;  %v4172_v33 = vld [vmem:[%s5508_s13 + $0x64] ss:$8 sps:$4 sm:$0xff]  }
 0x21f   : > { %3803 = vmatpush3.bf16.msra.mxu1 %v4142_v35  ;;  %3821 = vmatpush3.bf16.msra.mxu0 %v4143_v36  ;;  %v4170_v36 = vld [vmem:[%s5508_s13 + $0x60] ss:$8 sps:$4 sm:$0xff]  }
 0x220   : > { %3804 = vmatprep.subr.bf16.mxu1 %v4144_v37  ;;  %3822 = vmatprep.subr.bf16.mxu0 %v4145_v38 }
 0x223   : > { %3805 = vmatpush3.bf16.msra.mxu1 %v4146_v39  ;;  %3823 = vmatpush3.bf16.msra.mxu0 %v4147_v40  ;;  %v1827_v40 = vld [vmem:[%s6061_s0] sm:$0x3] }
 0x224   : > { %3824 = vmatprep.subr.bf16.mxu0 %v4148_v41  ;;  %1970 = vmatprep.subr.bf16.mxu1 %v4154_v13  ;;  %v4175_v41 = vld [vmem:[%s5508_s13 + $0x74] ss:$8 sps:$4 sm:$0xff]   ;;  %v4188_v13 = vld [vmem:[%s5517_s11 + $0x40] ss:$8 sps:$4 sm:$0xff]  }
 0x227   : > { %3825 = vmatpush3.bf16.msra.mxu0 %v4149_v42 }
 0x228   : > { %3826 = vmatprep.subr.bf16.mxu0 %v4150_v43  ;;  %v4173_v43 = vld [vmem:[%s5508_s13 + $0x70] ss:$8 sps:$4 sm:$0xff]   ;;  %s4816_s13 = smov 96  }
 0x22b   : > { %3827 = vmatpush3.bf16.msra.mxu0 %v4151_v44 }
 0x2d9   : > { %v1378_v52 = vpop.f32.mrb[0].mxu0 }
 0x2da   : > { %v1379_v53 = vadd.f32 %v1378_v52, %v1313_v50  ;;  %v1380_v54 = vpop.f32.mrb[1].mxu0  ;;  %v4176_v50 = vld [vmem:[%s5517_s11] ss:$8 sps:$4 sm:$0xff]  }
 0x2db   : > { %v1381_v55 = vadd.f32 %v1380_v54, %v1317_v51  ;;  %v1382_v56 = vpop.f32.mrb[2].mxu0  ;;  %v4178_v51 = vld [vmem:[%s5517_s11 + $0x4] ss:$8 sps:$4 sm:$0xff]   ;;  %v4179_v54 = vld [vmem:[%s5517_s11 + $0x10] ss:$8 sps:$4 sm:$0xff]  }
 0x2dc   : > { %v1385_v58 = vmax.f32 %v1379_v53, 0.0  ;;  %v1383_v59 = vpop.f32.mrb[3].mxu0  ;;  %v4181_v53 = vld [vmem:[%s5517_s11 + $0x14] ss:$8 sps:$4 sm:$0xff]   ;;  %2129 = vmatprep.subr.bf16.mxu0 %v4178_v51  ;;  %v4182_v56 = vld [vmem:[%s5517_s11 + $0x20] ss:$8 sps:$4 sm:$0xff]  }
 0x2dd   : > { %v1386_v60 = vmax.f32 %v1381_v55, 0.0  ;;  %v4184_v55 = vld [vmem:[%s5517_s11 + $0x24] ss:$8 sps:$4 sm:$0xff]  }
 0x2de   : > { %v1419_v1 = vpack.c.bf16 %v1385_v58, %v1385_v58  ;;  %v4185_v58 = vld [vmem:[%s5517_s11 + $0x30] ss:$8 sps:$4 sm:$0xff]  }
 0x2df   : > { %v1420_v62 = vpack.c.bf16 %v1386_v60, %v1386_v60 }
 0x2e1   : > { %1556 = vmatprep.mubr.bf16.mxu1 %v1420_v62  ;;  %v1640_v2 = vpop.f32.mrb[4].mxu0 }
 0x2e2   : > { %v1641_v3 = vadd.f32 %v1640_v2, %v1576_v61  ;;  %1557 = vmatmul.mubr.bf16.vlgmr.msra.gmra.mrb[0].mxu1 %v1419_v1  ;;  %v1642_v4 = vpop.f32.mrb[5].mxu0 }
 0x2e3   : > { %v1643_v5 = vadd.f32 %v1642_v4, %v1580_v63  ;;  %v1644_v6 = vpop.f32.mrb[6].mxu0  ;;  %2002 = vmatprep.mubr.bf16.mxu1 %v4813_v0  ;;  %1971 = vmatpush1.bf16.msra.mxu1 %v4152_v12  ;;  %v4190_v12 = vld [vmem:[%s5517_s11 + $0x44] ss:$8 sps:$4 sm:$0xff]  }
 0x2e4   : > { %v1647_v7 = vmax.f32 %v1641_v3, 0.0  ;;  %v1645_v8 = vpop.f32.mrb[7].mxu0  ;;  %1972 = vmatprep.subr.bf16.mxu1 %v4157_v14  ;;  %v4193_v14 = vld [vmem:[%s5517_s11 + $0x54] ss:$8 sps:$4 sm:$0xff]  }
 0x2e5   : > { %v1648_v9 = vmax.f32 %v1643_v5, 0.0 }
 0x2e6   : > { %v1681_v11 = vpack.c.bf16 %v1647_v7, %v1647_v7 }
 0x2e7   : > { %v1682_v10 = vpack.c.bf16 %v1648_v9, %v1648_v9  ;;  %1973 = vmatpush1.bf16.msra.mxu1 %v4155_v15  ;;  %v4191_v15 = vld [vmem:[%s5517_s11 + $0x50] ss:$8 sps:$4 sm:$0xff]  }
 0x2e8   : > { %1974 = vmatprep.subr.bf16.mxu1 %v4160_v16  ;;  %v4196_v16 = vld [vmem:[%s5517_s11 + $0x64] ss:$8 sps:$4 sm:$0xff]  }
 0x2e9   : > { %1818 = vmatprep.mubr.bf16.mxu0 %v1682_v10 }
 0x2ea   : > { %1819 = vmatmul.mubr.bf16.vlgmr.msra.gmra.mrb[8].mxu0 %v1681_v11 }
 0x2eb   : > { %2161 = vmatprep.mubr.bf16.mxu0 %v4813_v0  ;;  %1975 = vmatpush1.bf16.msra.mxu1 %v4158_v17  ;;  %v4194_v17 = vld [vmem:[%s5517_s11 + $0x60] ss:$8 sps:$4 sm:$0xff]  }
 0x2ec   : > { %1976 = vmatprep.subr.bf16.mxu1 %v4163_v18  ;;  %2130 = vmatpush1.bf16.msra.mxu0 %v4176_v50  ;;  %v4199_v18 = vld [vmem:[%s5517_s11 + $0x74] ss:$8 sps:$4 sm:$0xff]  }
 0x2ed   : > { %2131 = vmatprep.subr.bf16.mxu0 %v4181_v53 }
 0x2ef   : > { %1977 = vmatpush1.bf16.msra.mxu1 %v4161_v19  ;;  %v4197_v19 = vld [vmem:[%s5517_s11 + $0x70] ss:$8 sps:$4 sm:$0xff]   ;;  %s6064_s11 = scalar_lea.vmem [#allocation20], %s5496_s27 }
 0x2f0   : > { %1978 = vmatprep.subr.bf16.mxu1 %v4166_v22  ;;  %2132 = vmatpush1.bf16.msra.mxu0 %v4179_v54  ;;  %v4201_v22 = vld [vmem:[%s5527_s10 + $0x8] sm:$0xff]  }
 0x2f1   : > { %2133 = vmatprep.subr.bf16.mxu0 %v4184_v55 }
 0x2f3   : > { %1979 = vmatpush1.bf16.msra.mxu1 %v4164_v25  ;;  %v1878_v25 = vld [vmem:[%s5511_s26] sm:$0x3]  ;;  %s6063_s26 = scalar_lea.vmem [#allocation17], %s5496_s27 }
 0x2f4   : > { %1980 = vmatprep.subr.bf16.mxu1 %v4169_v27  ;;  %2134 = vmatpush1.bf16.msra.mxu0 %v4182_v56  ;;  %v1887_v27 = vrot.slane %v1878_v25, %v5657_v49 }
 0x2f5   : > { %2135 = vmatprep.subr.bf16.mxu0 %v4187_v57 }
 0x2f7   : > { %1981 = vmatpush1.bf16.msra.mxu1 %v4167_v28 }
 0x2f8   : > { %1982 = vmatprep.subr.bf16.mxu1 %v4172_v33  ;;  %2136 = vmatpush1.bf16.msra.mxu0 %v4185_v58  ;;  %v4208_v58 = vld [vmem:[%s5535_s23] sm:$0xff]  }
 0x2f9   : > { %2137 = vmatprep.subr.bf16.mxu0 %v4190_v12 }
 0x2fb   : > { %1983 = vmatpush1.bf16.msra.mxu1 %v4170_v36 }
 0x2fc   : > { %1984 = vmatprep.subr.bf16.mxu1 %v4175_v41  ;;  %2138 = vmatpush1.bf16.msra.mxu0 %v4188_v13  ;;  %v4206_v41 = vld [vmem:[%s5527_s10 + $0x30] sm:$0xff]  }
 0x2fd   : > { %2139 = vmatprep.subr.bf16.mxu0 %v4193_v14 }
 0x2ff   : > { %1985 = vmatpush1.bf16.msra.mxu1 %v4173_v43  ;;  %v2037_v43 = vld [vmem:[%s5520_s1] sm:$0x3]  ;;  %s1129_s1 = scalar_lea.vmem [#allocation25], %s5496_s27  ;;  %s3789_s27 = sshll.u32 %s6071_s8, 6 }
 0x300   : > { %2140 = vmatpush1.bf16.msra.mxu0 %v4191_v15 }
 0x301   : > { %2141 = vmatprep.subr.bf16.mxu0 %v4196_v16  ;;  %v4214_v16 = vld [vmem:[%s5544_s25 + $0x4] ss:$16 sps:$4 sm:$0xff]  }
 0x304   : > { %2142 = vmatpush1.bf16.msra.mxu0 %v4194_v17  ;;  %v4217_v17 = vld [vmem:[%s5544_s25 + $0xc] ss:$16 sps:$4 sm:$0xff]  }
 0x305   : > { %2143 = vmatprep.subr.bf16.mxu0 %v4199_v18  ;;  %v4212_v18 = vld [vmem:[%s5544_s25] ss:$16 sps:$4 sm:$0xff]  }
 0x308   : > { %2144 = vmatpush1.bf16.msra.mxu0 %v4197_v19  ;;  %v4215_v19 = vld [vmem:[%s5544_s25 + $0x8] ss:$16 sps:$4 sm:$0xff]  }
 0x309   : > { %3949 = vmatprep.subr.bf16.mxu0 %v4208_v58 }
 0x3b5   : > { %v3806_v20 = vpop.f32.mrb[0].mxu1 }
 0x3b6   : > { %v3807_v21 = vpop.f32.mrb[1].mxu1 }
 0x3b7   : > { %v3808_v23 = vadd.f32 %v3807_v21, %v3806_v20  ;;  %v3809_v24 = vpop.f32.mrb[2].mxu1  ;;  %v4200_v20 = vld [vmem:[%s5527_s10] sm:$0xff]   ;;  %v4817_v21 = vmov 0.0  }
 0x3b8   : > { %v3810_v26 = vpop.f32.mrb[3].mxu1  ;;  %3929 = vmatprep.subr.bf16.mxu1 %v4817_v21  ;;  %v4203_v24 = vld [vmem:[%s5527_s10 + $0x18] sm:$0xff]  }
 0x3b9   : > { %v1559_v38 = vadd.f32 %v3808_v23, %v3632_v29  ;;  %v4202_v23 = vld [vmem:[%s5527_s10 + $0x10] sm:$0xff]   ;;  %v1883_v26 = vrot.slane %v1878_v25, %v5654_v47  ;;  %v4226_v25 = vld [vmem:[%s5544_s25 + $0x44] ss:$16 sps:$4 sm:$0xff]  }
 0x3bb   : > { %v1564_v44 = vmax.f32 %v1559_v38, 0.0 }
 0x3bd   : > { %v3828_v30 = vpop.f32.mrb[8].mxu0  ;;  %v4103_v52 = vpack.i.bf16 %v1828_v48, %v1564_v44 }
 0x3be   : > { %v3829_v31 = vpop.f32.mrb[9].mxu0 }
 0x3bf   : > { %v3830_v34 = vadd.f32 %v3829_v31, %v3828_v30  ;;  %v3831_v35 = vpop.f32.mrb[10].mxu0 }
 0x3c0   : > { %v3832_v37 = vpop.f32.mrb[11].mxu0 }
 0x3c1   : > { %v1821_v39 = vadd.f32 %v3830_v34, %v3654_v32 }
 0x3c3   : > { %v1826_v42 = vmax.f32 %v1821_v39, 0.0  ;;  %v4204_v39 = vld [vmem:[%s5527_s10 + $0x20] sm:$0xff]  }
 0x3c5   : > { %1834 = vrot.lane.b32.xlu1 %v1826_v42, %s4814_s30  ;;  %v4098_v45 = vpack.i.bf16 %v1826_v42, %v1827_v40  ;;  %v4205_v40 = vld [vmem:[%s5527_s10 + $0x28] sm:$0xff]   ;;  %v4207_v42 = vld [vmem:[%s5527_s10 + $0x38] sm:$0xff]  }
 0x3c7   : > { %4099 = vrot.lane.b32.xlu0 %v4098_v45, %s4815_s14  ;;  %v2046_v45 = vrot.slane %v2037_v43, %v5657_v49 }
 0x3cb   : > { %4104 = vrot.lane.b32.xlu0 %v4103_v52, %s4816_s13 }
 0x437   : > { %v1835_v5 = vpop.permute.xlu1 %1834 }
 0x439   : > { %v4100_v59 = vpop.permute.xlu0 %4099 }
 0x43a   : > { %v4101_v60 = vunpack.i.l.bf16 %v4100_v59  ;;  %v4102_v63 = vunpack.i.h.bf16 %v4100_v59  ;;  %v4209_v59 = vld [vmem:[%s5535_s23 + $0x8] sm:$0xff]  }
 0x43c   : > { %v1841_v1 = vsel %vm1340_vm0, %v1564_v44, %v4101_v60  ;;  %v2042_v44 = vrot.slane %v2037_v43, %v5654_v47 }
 0x43d   : > { %v4105_v61 = vpop.permute.xlu0 %4104  ;;  %v1843_v7 = vsel %vm1842_vm1, %v1841_v1, %v1835_v5 }
 0x43e   : > { %v4106_v62 = vunpack.i.l.bf16 %v4105_v61  ;;  %v4107_v2 = vunpack.i.h.bf16 %v4105_v61  ;;  %v4211_v61 = vld [vmem:[%s5535_s23 + $0x18] sm:$0xff]  }
 0x440   : > { %v1853_v3 = vsel %vm1340_vm0, %v4106_v62, %v4101_v60  ;;  %v1845_v9 = vsel %vm1844_vm2, %v1843_v7, %v4107_v2  ;;  %v4210_v60 = vld [vmem:[%s5535_s23 + $0x10] sm:$0xff]  }
 0x441   : > { %v1854_v4 = vsel %vm1842_vm1, %v1853_v3, %v4102_v63  ;;  %v3703_v62 = vld [vmem:[%s6063_s26] ss:$0 sm:$0xff] }
 0x442   : > { %v1855_v6 = vsel %vm1844_vm2, %v1854_v4, %v4107_v2 }
 0x443   : > { %v1857_v8 = vrot.slane %v1855_v6, 6 }
 0x445   : > { %v1860_v10 = vsel %vm1859_vm3, %v1845_v9, %v1857_v8 }
 0x446   : > { %v1877_v11 = vpack.c.bf16 %v1860_v10, %v1860_v10 }
 0x448   : > { %2003 = vmatmul.mubr.bf16.vlgmr.msra.gmra.mrb[4].mxu1 %v1877_v11 }
 0x449   : > { %3930 = vmatpush3.bf16.msra.mxu1 %v4200_v20  ;;  %3945 = vmatprep.mubr.msk.bf16.mxu1 %vm4818_vm5, %v4817_v21  ;;  %v4220_v20 = vld [vmem:[%s5544_s25 + $0x24] ss:$16 sps:$4 sm:$0xff]  }
 0x44a   : > { %3931 = vmatprep.subr.bf16.mxu1 %v4817_v21 }
 0x44d   : > { %3932 = vmatpush3.bf16.msra.mxu1 %v4201_v22  ;;  %v4218_v22 = vld [vmem:[%s5544_s25 + $0x20] ss:$16 sps:$4 sm:$0xff]  }
 0x44e   : > { %3933 = vmatprep.subr.bf16.mxu1 %v4817_v21 }
 0x451   : > { %3934 = vmatpush3.bf16.msra.mxu1 %v4202_v23  ;;  %v4221_v23 = vld [vmem:[%s5544_s25 + $0x28] ss:$16 sps:$4 sm:$0xff]  }
 0x452   : > { %3935 = vmatprep.subr.bf16.mxu1 %v4817_v21 }
 0x455   : > { %3936 = vmatpush3.bf16.msra.mxu1 %v4203_v24  ;;  %v4224_v24 = vld [vmem:[%s5544_s25 + $0x40] ss:$16 sps:$4 sm:$0xff]  }
 0x456   : > { %3937 = vmatprep.subr.bf16.mxu1 %v4817_v21 }
 0x459   : > { %3938 = vmatpush3.bf16.msra.mxu1 %v4204_v39 }
 0x45a   : > { %3939 = vmatprep.subr.bf16.mxu1 %v4817_v21 }
 0x45d   : > { %3940 = vmatpush3.bf16.msra.mxu1 %v4205_v40 }
 0x45e   : > { %3941 = vmatprep.subr.bf16.mxu1 %v4817_v21 }
 0x461   : > { %3942 = vmatpush3.bf16.msra.mxu1 %v4206_v41 }
 0x462   : > { %3943 = vmatprep.subr.bf16.mxu1 %v4817_v21  ;;  %v4223_v21 = vld [vmem:[%s5544_s25 + $0x2c] ss:$16 sps:$4 sm:$0xff]  }
 0x465   : > { %3944 = vmatpush3.bf16.msra.mxu1 %v4207_v42 }
 0x466   : > { %2646 = vmatprep.subr.bf16.mxu1 %v4217_v17  ;;  %v4262_v17 = vld [vmem:[%s5629_s28 + $0x30] sm:$0xff]  }
 0x51b   : > { %v2004_v28 = vpop.f32.mrb[4].mxu1 }
 0x51c   : > { %v2006_v29 = vpop.f32.mrb[5].mxu1  ;;  %v2005_v30 = vadd.f32 %v2004_v28, %v1883_v26  ;;  %v4227_v26 = vld [vmem:[%s5544_s25 + $0x48] ss:$16 sps:$4 sm:$0xff]   ;;  %v4230_v28 = vld [vmem:[%s5544_s25 + $0x60] ss:$16 sps:$4 sm:$0xff]  }
 0x51d   : > { %v2007_v31 = vadd.f32 %v2006_v29, %v1887_v27  ;;  %v2008_v32 = vpop.f32.mrb[6].mxu1  ;;  %v4229_v27 = vld [vmem:[%s5544_s25 + $0x4c] ss:$16 sps:$4 sm:$0xff]   ;;  %v4232_v29 = vld [vmem:[%s5544_s25 + $0x64] ss:$16 sps:$4 sm:$0xff]  }
 0x51e   : > { %v2009_v33 = vpop.f32.mrb[7].mxu1  ;;  %v2011_v35 = vmax.f32 %v2005_v30, 0.0  ;;  %v4233_v30 = vld [vmem:[%s5544_s25 + $0x68] ss:$16 sps:$4 sm:$0xff]   ;;  %v3712_v32 = vld [vmem:[%s6064_s11] ss:$0 sm:$0xff] }
 0x51f   : > { %v2012_v34 = vmax.f32 %v2007_v31, 0.0  ;;  %v4235_v31 = vld [vmem:[%s5544_s25 + $0x6c] ss:$16 sps:$4 sm:$0xff]   ;;  %s6065_s25 = sld [smem:[#allocation61_spill]] }
 0x521   : > { %v2014_v36 = vrot.slane %v2012_v34, 4 }
 0x523   : > { %v2017_v37 = vsel %vm2016_vm4, %v2011_v35, %v2014_v36 }
 0x524   : > { %v2036_v38 = vpack.c.bf16 %v2017_v37, %v2017_v37 }
 0x526   : > { %2162 = vmatmul.mubr.bf16.vlgmr.msra.gmra.mrb[12].mxu0 %v2036_v38 }
 0x527   : > { %3950 = vmatpush3.bf16.msra.mxu0 %v4208_v58  ;;  %v4243_v58 = vld [vmem:[%s5629_s28 + $0x88] sm:$0xff]  }
 0x528   : > { %3951 = vmatprep.subr.bf16.mxu0 %v4209_v59 }
 0x52b   : > { %3952 = vmatpush3.bf16.msra.mxu0 %v4209_v59 }
 0x52c   : > { %3953 = vmatprep.subr.bf16.mxu0 %v4210_v60 }
 0x52f   : > { %3954 = vmatpush3.bf16.msra.mxu0 %v4210_v60  ;;  %v4244_v60 = vld [vmem:[%s5629_s28 + $0x50] sm:$0xff]  }
 0x530   : > { %3955 = vmatprep.subr.bf16.mxu0 %v4211_v61 }
 0x533   : > { %3956 = vmatpush3.bf16.msra.mxu0 %v4211_v61  ;;  %v4245_v61 = vld [vmem:[%s5629_s28 + $0xd0] sm:$0xff]  }
 0x534   : > { %2573 = vmatprep.subr.bf16.mxu0 %v4214_v16  ;;  %v4261_v16 = vld [vmem:[%s5629_s28 + $0xf0] sm:$0xff]  }
 0x5f9   : > { %v2163_v48 = vpop.f32.mrb[12].mxu0 }
 0x5fa   : > { %v2164_v50 = vadd.f32 %v2163_v48, %v2042_v44  ;;  %v2165_v51 = vpop.f32.mrb[13].mxu0  ;;  %v4237_v48 = vld [vmem:[%s5629_s28 + $0xc0] sm:$0xff]  }
 0x5fb   : > { %v2166_v52 = vadd.f32 %v2165_v51, %v2046_v45  ;;  %v2167_v53 = vpop.f32.mrb[14].mxu0  ;;  %v4236_v45 = vld [vmem:[%s5629_s28 + $0x40] sm:$0xff]  }
 0x5fc   : > { %v2170_v54 = vmax.f32 %v2164_v50, 0.0  ;;  %v2168_v55 = vpop.f32.mrb[15].mxu0  ;;  %v4238_v53 = vld [vmem:[%s5629_s28] sm:$0xff]  }
 0x5fd   : > { %v2171_v56 = vmax.f32 %v2166_v52, 0.0  ;;  %v4240_v55 = vld [vmem:[%s5629_s28 + $0x48] sm:$0xff]  }
 0x5fe   : > { %2172 = vst [vmem:[#allocation2] sm:$0xff] %v2170_v54 }
 0x5ff   : > { %2173 = vst [vmem:[#allocation2 + $0x8] sm:$0xff] %v2171_v56  ;;  %v2192_v57 = vpack.c.bf16 %v2171_v56, %v2170_v54  ;;  %v4239_v54 = vld [vmem:[%s5629_s28 + $0x80] sm:$0xff]   ;;  %v4241_v56 = vld [vmem:[%s5629_s28 + $0xc8] sm:$0xff]  }
 0x601   : > { %3946 = vmatmul.mubr.bf16.vlgmr.msra.gmra.mrb[8].mxu1 %v2192_v57  ;;  %v4242_v57 = vld [vmem:[%s5629_s28 + $0x8] sm:$0xff]  }
 0x602   : > { %2678 = vmatprep.mubr.bf16.mxu1 %v4813_v0  ;;  %2647 = vmatpush1.bf16.msra.mxu1 %v4215_v19  ;;  %v4264_v19 = vld [vmem:[%s5629_s28 + $0x78] sm:$0xff]  }
 0x603   : > { %2648 = vmatprep.subr.bf16.mxu1 %v4223_v21  ;;  %v4266_v21 = vld [vmem:[%s5629_s28 + $0x38] sm:$0xff]  }
 0x606   : > { %2649 = vmatpush1.bf16.msra.mxu1 %v4221_v23 }
 0x607   : > { %2650 = vmatprep.subr.bf16.mxu1 %v4229_v27 }
 0x60a   : > { %2651 = vmatpush1.bf16.msra.mxu1 %v4227_v26 }
 0x60b   : > { %2652 = vmatprep.subr.bf16.mxu1 %v4235_v31 }
 0x60e   : > { %2653 = vmatpush1.bf16.msra.mxu1 %v4233_v30 }
 0x60f   : > { %3889 = vmatprep.subr.bf16.mxu1 %v4237_v48 }
 0x6d4   : > { %v2282_v63 = vpop.f32.mrb[8].mxu1 }
 0x6d5   : > { %v2283_v1 = vadd.f32 %v3703_v62, %v2282_v63  ;;  %v3947_v2 = vpop.f32.mrb[9].mxu1 }
 0x6d6   : > { %v2285_v3 = vpop.f32.mrb[10].mxu1  ;;  %v4247_v2 = vld [vmem:[%s5629_s28 + $0x90] sm:$0xff]  }
 0x6d7   : > { %v2289_v4 = vmax.f32 %v2283_v1, 0.0  ;;  %v2286_v5 = vadd.f32 %v3703_v62, %v2285_v3  ;;  %v3948_v6 = vpop.f32.mrb[11].mxu1  ;;  %v4246_v1 = vld [vmem:[%s5629_s28 + $0x10] sm:$0xff]   ;;  %v4248_v3 = vld [vmem:[%s5629_s28 + $0x58] sm:$0xff]  }
 0x6d8   : > { %v4251_v6 = vld [vmem:[%s5629_s28 + $0x98] sm:$0xff]  }
 0x6d9   : > { %2291 = vst.msk [vmem:[#allocation2] sm:$0xff] %vm1842_vm1, %v2289_v4  ;;  %v2290_v7 = vmax.f32 %v2286_v5, 0.0  ;;  %2295 = vrot.lane.b32.xlu1 %v2289_v4, %s4814_s30  ;;  %v4249_v4 = vld [vmem:[%s5629_s28 + $0xd8] sm:$0xff]  }
 0x6da   : > { %v4250_v5 = vld [vmem:[%s5629_s28 + $0x18] sm:$0xff]  }
 0x6db   : > { %2292 = vst.msk [vmem:[#allocation2 + $0x8] sm:$0xff] %vm1842_vm1, %v2290_v7  ;;  %2297 = vrot.lane.b32.xlu0 %v2290_v7, %s4814_s30  ;;  %v4252_v7 = vld [vmem:[%s5629_s28 + $0x60] sm:$0xff]  }
 0x6e0   : > { %v2303_v8 = vld [vmem:[#allocation2] sm:$0xff] }
 0x6e2   : > { %v2304_v9 = vld [vmem:[#allocation2 + $0x8] sm:$0xff] }
 0x6e3   : > { %v2315_v10 = vpack.c.bf16 %v2304_v9, %v2303_v8  ;;  %v4253_v8 = vld [vmem:[%s5629_s28 + $0xe0] sm:$0xff]  }
 0x6e4   : > { %v4254_v9 = vld [vmem:[%s5629_s28 + $0x20] sm:$0xff]  }
 0x6e5   : > { %3957 = vmatprep.mubr.msk.bf16.mxu0 %vm1842_vm1, %v2315_v10  ;;  %v4255_v10 = vld [vmem:[%s5629_s28 + $0xa0] sm:$0xff]  }
 0x74b   : > { %v2296_v11 = vpop.permute.xlu1 %2295 }
 0x74c   : > { %2301 = vst.msk [vmem:[#allocation2 + $0x10] sm:$0xff] %vm1842_vm1, %v2296_v11  ;;  %v4256_v11 = vld [vmem:[%s5629_s28 + $0x68] sm:$0xff]  }
 0x74d   : > { %v2298_v12 = vpop.permute.xlu0 %2297 }
 0x74e   : > { %2302 = vst.msk [vmem:[#allocation2 + $0x18] sm:$0xff] %vm1842_vm1, %v2298_v12  ;;  %v4257_v12 = vld [vmem:[%s5629_s28 + $0xe8] sm:$0xff]  }
 0x753   : > { %v2305_v13 = vld [vmem:[#allocation2 + $0x10] sm:$0xff] }
 0x755   : > { %v2306_v14 = vld [vmem:[#allocation2 + $0x18] sm:$0xff] }
 0x756   : > { %v2316_v15 = vpack.c.bf16 %v2306_v14, %v2305_v13  ;;  %v4258_v13 = vld [vmem:[%s5629_s28 + $0x28] sm:$0xff]  }
 0x757   : > { %v4259_v14 = vld [vmem:[%s5629_s28 + $0xa8] sm:$0xff]  }
 0x758   : > { %3958 = vmatmul.mubr.msk.bf16.vlgmr.msra.gmra.mrb[16].mxu0 %vm1842_vm1, %v2316_v15  ;;  %v4260_v15 = vld [vmem:[%s5629_s28 + $0x70] sm:$0xff]  }
 0x759   : > { %2605 = vmatprep.mubr.bf16.mxu0 %v4813_v0  ;;  %2574 = vmatpush1.bf16.msra.mxu0 %v4212_v18  ;;  %v4263_v18 = vld [vmem:[%s5629_s28 + $0xb0] sm:$0xff]  }
 0x75a   : > { %2575 = vmatprep.subr.bf16.mxu0 %v4220_v20  ;;  %v4265_v20 = vld [vmem:[%s5629_s28 + $0xf8] sm:$0xff]  }
 0x75d   : > { %2576 = vmatpush1.bf16.msra.mxu0 %v4218_v22  ;;  %v4267_v22 = vld [vmem:[%s5629_s28 + $0xb8] sm:$0xff]  }
 0x75e   : > { %2577 = vmatprep.subr.bf16.mxu0 %v4226_v25 }
 0x761   : > { %2578 = vmatpush1.bf16.msra.mxu0 %v4224_v24 }
 0x762   : > { %2579 = vmatprep.subr.bf16.mxu0 %v4232_v29 }
 0x765   : > { %2580 = vmatpush1.bf16.msra.mxu0 %v4230_v28 }
 0x766   : > { %3849 = vmatprep.subr.bf16.mxu0 %v4236_v45 }
 0x82b   : > { %v3959_v33 = vpop.f32.mrb[16].mxu0 }
 0x82c   : > { %v2397_v34 = vadd.f32 %v3959_v33, %v3712_v32  ;;  %v2388_v35 = vpop.f32.mrb[17].mxu0  ;;  %v2471_v33 = vsub.s32 2, %v5651_v46 }
 0x82d   : > { %v2389_v36 = vadd.f32 %v3712_v32, %v2388_v35  ;;  %v3960_v37 = vpop.f32.mrb[18].mxu0  ;;  %v2475_v35 = vsub.s32 3, %v5651_v46 }
 0x82e   : > { %v2405_v38 = vmax.f32 %v2397_v34, 0.0  ;;  %v2400_v39 = vadd.f32 %v3960_v37, %v3712_v32  ;;  %v2391_v40 = vpop.f32.mrb[19].mxu0  ;;  %v2459_v34 = vld [vmem:[%s5547_s20] sm:$0xf]  ;;  %s5879_s20 = scalar_lea.vmem %s6065_s25, %s3789_s27 }
 0x82f   : > { %v2403_v41 = vmax.f32 %v2389_v36, 0.0  ;;  %v2392_v42 = vadd.f32 %v3712_v32, %v2391_v40  ;;  %v5827_v36 = vrot.slane %v2459_v34, %v5654_v47  ;;  %v5829_v37 = vrot.slane %v2459_v34, %v2471_v33 }
 0x830   : > { %2409 = vst.msk [vmem:[#allocation2 + $0x10] sm:$0xff] %vm1842_vm1, %v2405_v38  ;;  %v2406_v43 = vmax.f32 %v2400_v39, 0.0 }
 0x831   : > { %2407 = vst.msk [vmem:[#allocation2] sm:$0xff] %vm1842_vm1, %v2403_v41  ;;  %v2404_v44 = vmax.f32 %v2392_v42, 0.0  ;;  %2415 = vrot.lane.b32.xlu1 %v2403_v41, %s4814_s30 }
 0x832   : > { %2410 = vst.msk [vmem:[#allocation2 + $0x18] sm:$0xff] %vm1842_vm1, %v2406_v43 }
 0x833   : > { %2408 = vst.msk [vmem:[#allocation2 + $0x8] sm:$0xff] %vm1842_vm1, %v2404_v44  ;;  %2417 = vrot.lane.b32.xlu0 %v2404_v44, %s4814_s30 }
 0x835   : > { %2419 = vrot.lane.b32.xlu1 %v2405_v38, %s4814_s30  ;;  %v5832_v38 = vrot.slane %v2459_v34, %v5657_v49 }
 0x837   : > { %2421 = vrot.lane.b32.xlu0 %v2406_v43, %s4814_s30  ;;  %v2433_v62 = vld [vmem:[#allocation2 + $0x10] sm:$0xff] }
 0x838   : > { %v2431_v50 = vld [vmem:[#allocation2] sm:$0xff] }
 0x839   : > { %v2434_v59 = vld [vmem:[#allocation2 + $0x18] sm:$0xff] }
 0x83a   : > { %v2432_v51 = vld [vmem:[#allocation2 + $0x8] sm:$0xff]  ;;  %v2456_v63 = vpack.c.bf16 %v2434_v59, %v2433_v62 }
 0x83b   : > { %v2455_v52 = vpack.c.bf16 %v2432_v51, %v2431_v50 }
 0x83d   : > { %3735 = vmatmul.mubr.msk.bf16.vlgmr.msra.gmra.mrb[20].mxu0 %vm1842_vm1, %v2455_v52  ;;  %3739 = vmatmul.mubr.msk.bf16.vlgmr.msra.gmra.mrb[12].mxu1 %vm1842_vm1, %v2455_v52 }
 0x83e   : > { %2615 = vmatprep.mubr.bf16.mxu0 %v4813_v0  ;;  %2688 = vmatprep.mubr.bf16.mxu1 %v4813_v0 }
 0x83f   : > { %3850 = vmatpush3.bf16.msra.mxu0 %v4238_v53  ;;  %3890 = vmatpush3.bf16.msra.mxu1 %v4239_v54 }
 0x840   : > { %3851 = vmatprep.subr.bf16.mxu0 %v4240_v55  ;;  %3891 = vmatprep.subr.bf16.mxu1 %v4241_v56 }
 0x843   : > { %3852 = vmatpush3.bf16.msra.mxu0 %v4242_v57  ;;  %3892 = vmatpush3.bf16.msra.mxu1 %v4243_v58 }
 0x844   : > { %3853 = vmatprep.subr.bf16.mxu0 %v4244_v60  ;;  %3893 = vmatprep.subr.bf16.mxu1 %v4245_v61 }
 0x845   : > { %3736 = vmatmul.mubr.msk.bf16.gmra.mrb[24].mxu0 %vm1842_vm1, %v2456_v63  ;;  %3740 = vmatmul.mubr.msk.bf16.gmra.mrb[16].mxu1 %vm1842_vm1, %v2456_v63 }
 0x846   : > { %2625 = vmatprep.mubr.bf16.mxu0 %v4813_v0  ;;  %2698 = vmatprep.mubr.bf16.mxu1 %v4813_v0 }
 0x847   : > { %3854 = vmatpush3.bf16.msra.mxu0 %v4246_v1  ;;  %3894 = vmatpush3.bf16.msra.mxu1 %v4247_v2 }
 0x848   : > { %3855 = vmatprep.subr.bf16.mxu0 %v4248_v3  ;;  %3895 = vmatprep.subr.bf16.mxu1 %v4249_v4 }
 0x84b   : > { %3856 = vmatpush3.bf16.msra.mxu0 %v4250_v5  ;;  %3896 = vmatpush3.bf16.msra.mxu1 %v4251_v6 }
 0x84c   : > { %3857 = vmatprep.subr.bf16.mxu0 %v4252_v7  ;;  %3897 = vmatprep.subr.bf16.mxu1 %v4253_v8 }
 0x84f   : > { %3858 = vmatpush3.bf16.msra.mxu0 %v4254_v9  ;;  %3898 = vmatpush3.bf16.msra.mxu1 %v4255_v10 }
 0x850   : > { %3859 = vmatprep.subr.bf16.mxu0 %v4256_v11  ;;  %3899 = vmatprep.subr.bf16.mxu1 %v4257_v12 }
 0x853   : > { %3860 = vmatpush3.bf16.msra.mxu0 %v4258_v13  ;;  %3900 = vmatpush3.bf16.msra.mxu1 %v4259_v14 }
 0x854   : > { %3861 = vmatprep.subr.bf16.mxu0 %v4260_v15  ;;  %3901 = vmatprep.subr.bf16.mxu1 %v4261_v16 }
 0x857   : > { %3862 = vmatpush3.bf16.msra.mxu0 %v4262_v17  ;;  %3902 = vmatpush3.bf16.msra.mxu1 %v4263_v18 }
 0x858   : > { %3863 = vmatprep.subr.bf16.mxu0 %v4264_v19  ;;  %3903 = vmatprep.subr.bf16.mxu1 %v4265_v20 }
 0x85b   : > { %3864 = vmatpush3.bf16.msra.mxu0 %v4266_v21  ;;  %3904 = vmatpush3.bf16.msra.mxu1 %v4267_v22 }
 0x8a3   : > { %v2416_v23 = vpop.permute.xlu1 %2415 }
 0x8a4   : > { %2427 = vst.msk [vmem:[#allocation2 + $0x20] sm:$0xff] %vm1842_vm1, %v2416_v23 }
 0x8a5   : > { %v2418_v24 = vpop.permute.xlu0 %2417 }
 0x8a6   : > { %2428 = vst.msk [vmem:[#allocation2 + $0x28] sm:$0xff] %vm1842_vm1, %v2418_v24 }
 0x8a7   : > { %v2420_v25 = vpop.permute.xlu1 %2419 }
 0x8a8   : > { %2429 = vst.msk [vmem:[#allocation2 + $0x30] sm:$0xff] %vm1842_vm1, %v2420_v25 }
 0x8a9   : > { %v2422_v26 = vpop.permute.xlu0 %2421 }
 0x8aa   : > { %2430 = vst.msk [vmem:[#allocation2 + $0x38] sm:$0xff] %vm1842_vm1, %v2422_v26 }
 0x8ab   : > { %v2435_v27 = vld [vmem:[#allocation2 + $0x20] sm:$0xff] }
 0x8ad   : > { %v2436_v28 = vld [vmem:[#allocation2 + $0x28] sm:$0xff] }
 0x8ae   : > { %v2457_v29 = vpack.c.bf16 %v2436_v28, %v2435_v27 }
 0x8af   : > { %v2437_v31 = vld [vmem:[#allocation2 + $0x30] sm:$0xff] }
 0x8b0   : > { %3737 = vmatmul.mubr.msk.bf16.gmra.mrb[28].mxu0 %vm1842_vm1, %v2457_v29  ;;  %3741 = vmatmul.mubr.msk.bf16.gmra.mrb[20].mxu1 %vm1842_vm1, %v2457_v29 }
 0x8b1   : > { %2635 = vmatprep.mubr.bf16.mxu0 %v4813_v0  ;;  %2708 = vmatprep.mubr.bf16.mxu1 %v4813_v0  ;;  %v2438_v30 = vld [vmem:[#allocation2 + $0x38] sm:$0xff]  ;;  %v5834_v0 = vrot.slane %v2459_v34, %v2475_v35 }
 0x8b2   : > { %v2458_v32 = vpack.c.bf16 %v2438_v30, %v2437_v31 }
 0x8b8   : > { %3738 = vmatmul.mubr.msk.bf16.gmra.mrb[32].mxu0 %vm1842_vm1, %v2458_v32  ;;  %3742 = vmatmul.mubr.msk.bf16.gmra.mrb[24].mxu1 %vm1842_vm1, %v2458_v32 }
 0x910   : > { %v2607_v39 = vpop.f32.mrb[20].mxu0  ;;  %v2680_v40 = vpop.f32.mrb[12].mxu1 }
 0x911   : > { %v2608_v41 = vadd.f32 %v2607_v39, %v5827_v36  ;;  %v2681_v42 = vadd.f32 %v2680_v40, %v5829_v37  ;;  %v2609_v43 = vpop.f32.mrb[21].mxu0  ;;  %v2682_v44 = vpop.f32.mrb[13].mxu1 }
 0x912   : > { %v2610_v46 = vadd.f32 %v2609_v43, %v5832_v38  ;;  %v2683_v47 = vadd.f32 %v2682_v44, %v5834_v0  ;;  %v2611_v45 = vpop.f32.mrb[22].mxu0  ;;  %v2684_v48 = vpop.f32.mrb[14].mxu1 }
 0x913   : > { %v2612_v50 = vadd.f32 %v2611_v45, %v5827_v36  ;;  %v2685_v49 = vadd.f32 %v2684_v48, %v5829_v37  ;;  %v2613_v51 = vpop.f32.mrb[23].mxu0  ;;  %v2686_v52 = vpop.f32.mrb[15].mxu1  ;;  %v2719_v55 = vmax.f32 %v2608_v41, 0.0  ;;  %v2721_v56 = vmax.f32 %v2681_v42, 0.0 }
 0x914   : > { %v2614_v53 = vadd.f32 %v2613_v51, %v5832_v38  ;;  %v2687_v54 = vadd.f32 %v2686_v52, %v5834_v0  ;;  %v2720_v59 = vmax.f32 %v2610_v46, 0.0  ;;  %v2722_v60 = vmax.f32 %v2683_v47, 0.0 }
 0x915   : > { %v2723_v57 = vmax.f32 %v2612_v50, 0.0  ;;  %v2725_v58 = vmax.f32 %v2685_v49, 0.0 }
 0x916   : > { %v2724_v61 = vmax.f32 %v2614_v53, 0.0  ;;  %v2726_v62 = vmax.f32 %v2687_v54, 0.0 }
 0x917   : > { %v2815_v63 = vpack.c.bf16 %v2723_v57, %v2719_v55  ;;  %v2817_v1 = vpack.c.bf16 %v2725_v58, %v2721_v56 }
 0x918   : > { %v2816_v2 = vpack.c.bf16 %v2724_v61, %v2720_v59  ;;  %v2818_v3 = vpack.c.bf16 %v2726_v62, %v2722_v60  ;;  %v2617_v4 = vpop.f32.mrb[24].mxu0  ;;  %v2690_v5 = vpop.f32.mrb[16].mxu1 }
 0x919   : > { %v2618_v6 = vadd.f32 %v2617_v4, %v5827_v36  ;;  %v2691_v7 = vadd.f32 %v2690_v5, %v5829_v37  ;;  %v2619_v8 = vpop.f32.mrb[25].mxu0  ;;  %v2692_v9 = vpop.f32.mrb[17].mxu1 }
 0x91a   : > { %v2620_v10 = vadd.f32 %v2619_v8, %v5832_v38  ;;  %v2693_v11 = vadd.f32 %v2692_v9, %v5834_v0  ;;  %v2621_v12 = vpop.f32.mrb[26].mxu0  ;;  %v2694_v13 = vpop.f32.mrb[18].mxu1  ;;  %3062 = vmatprep.mubr.bf16.mxu0 %v2816_v2  ;;  %3127 = vmatprep.mubr.bf16.mxu1 %v2818_v3 }
 0x91b   : > { %v2622_v14 = vadd.f32 %v2621_v12, %v5827_v36  ;;  %v2695_v15 = vadd.f32 %v2694_v13, %v5829_v37  ;;  %v2623_v16 = vpop.f32.mrb[27].mxu0  ;;  %v2696_v17 = vpop.f32.mrb[19].mxu1  ;;  %3063 = vmatmul.mubr.bf16.vlgmr.msra.gmra.mrb[36].mxu0 %v2815_v63  ;;  %3128 = vmatmul.mubr.bf16.vlgmr.msra.gmra.mrb[28].mxu1 %v2817_v1  ;;  %v2727_v20 = vmax.f32 %v2618_v6, 0.0  ;;  %v2729_v21 = vmax.f32 %v2691_v7, 0.0 }
 0x91c   : > { %v2624_v18 = vadd.f32 %v2623_v16, %v5832_v38  ;;  %v2697_v19 = vadd.f32 %v2696_v17, %v5834_v0  ;;  %v2728_v24 = vmax.f32 %v2620_v10, 0.0  ;;  %v2730_v25 = vmax.f32 %v2693_v11, 0.0 }
 0x91d   : > { %v2731_v22 = vmax.f32 %v2622_v14, 0.0  ;;  %v2733_v23 = vmax.f32 %v2695_v15, 0.0 }
 0x91e   : > { %v2732_v26 = vmax.f32 %v2624_v18, 0.0  ;;  %v2734_v27 = vmax.f32 %v2697_v19, 0.0 }
 0x91f   : > { %v2819_v28 = vpack.c.bf16 %v2731_v22, %v2727_v20  ;;  %v2821_v29 = vpack.c.bf16 %v2733_v23, %v2729_v21 }
 0x920   : > { %v2820_v30 = vpack.c.bf16 %v2732_v26, %v2728_v24  ;;  %v2822_v31 = vpack.c.bf16 %v2734_v27, %v2730_v25 }
 0x922   : > { %3070 = vmatprep.mubr.bf16.mxu0 %v2820_v30  ;;  %3135 = vmatprep.mubr.bf16.mxu1 %v2822_v31 }
 0x923   : > { %3071 = vmatmul.mubr.bf16.gmra.mrb[40].mxu0 %v2819_v28  ;;  %3136 = vmatmul.mubr.bf16.gmra.mrb[32].mxu1 %v2821_v29 }
 0x983   : > { %v2627_v32 = vpop.f32.mrb[28].mxu0  ;;  %v2700_v33 = vpop.f32.mrb[20].mxu1 }
 0x984   : > { %v2628_v34 = vadd.f32 %v2627_v32, %v5827_v36  ;;  %v2701_v35 = vadd.f32 %v2700_v33, %v5829_v37  ;;  %v2629_v39 = vpop.f32.mrb[29].mxu0  ;;  %v2702_v40 = vpop.f32.mrb[21].mxu1 }
 0x985   : > { %v2630_v41 = vadd.f32 %v2629_v39, %v5832_v38  ;;  %v2703_v42 = vadd.f32 %v2702_v40, %v5834_v0  ;;  %v2631_v43 = vpop.f32.mrb[30].mxu0  ;;  %v2704_v44 = vpop.f32.mrb[22].mxu1 }
 0x986   : > { %v2632_v46 = vadd.f32 %v2631_v43, %v5827_v36  ;;  %v2705_v47 = vadd.f32 %v2704_v44, %v5829_v37  ;;  %v2633_v45 = vpop.f32.mrb[31].mxu0  ;;  %v2706_v48 = vpop.f32.mrb[23].mxu1  ;;  %v2735_v51 = vmax.f32 %v2628_v34, 0.0  ;;  %v2737_v52 = vmax.f32 %v2701_v35, 0.0 }
 0x987   : > { %v2634_v50 = vadd.f32 %v2633_v45, %v5832_v38  ;;  %v2707_v49 = vadd.f32 %v2706_v48, %v5834_v0  ;;  %v2736_v55 = vmax.f32 %v2630_v41, 0.0  ;;  %v2738_v56 = vmax.f32 %v2703_v42, 0.0 }
 0x988   : > { %v2739_v53 = vmax.f32 %v2632_v46, 0.0  ;;  %v2741_v54 = vmax.f32 %v2705_v47, 0.0 }
 0x989   : > { %v2740_v57 = vmax.f32 %v2634_v50, 0.0  ;;  %v2742_v58 = vmax.f32 %v2707_v49, 0.0 }
 0x98a   : > { %v2823_v59 = vpack.c.bf16 %v2739_v53, %v2735_v51  ;;  %v2825_v60 = vpack.c.bf16 %v2741_v54, %v2737_v52 }
 0x98b   : > { %v2824_v61 = vpack.c.bf16 %v2740_v57, %v2736_v55  ;;  %v2826_v62 = vpack.c.bf16 %v2742_v58, %v2738_v56  ;;  %v2637_v63 = vpop.f32.mrb[32].mxu0  ;;  %v2710_v1 = vpop.f32.mrb[24].mxu1 }
 0x98c   : > { %v2638_v2 = vadd.f32 %v2637_v63, %v5827_v36  ;;  %v2711_v3 = vadd.f32 %v2710_v1, %v5829_v37  ;;  %v2639_v4 = vpop.f32.mrb[33].mxu0  ;;  %v2712_v5 = vpop.f32.mrb[25].mxu1 }
 0x98d   : > { %v2640_v6 = vadd.f32 %v2639_v4, %v5832_v38  ;;  %v2713_v7 = vadd.f32 %v2712_v5, %v5834_v0  ;;  %v2641_v8 = vpop.f32.mrb[34].mxu0  ;;  %v2714_v9 = vpop.f32.mrb[26].mxu1  ;;  %3078 = vmatprep.mubr.bf16.mxu0 %v2824_v61  ;;  %3143 = vmatprep.mubr.bf16.mxu1 %v2826_v62 }
 0x98e   : > { %v2642_v10 = vadd.f32 %v2641_v8, %v5827_v36  ;;  %v2715_v11 = vadd.f32 %v2714_v9, %v5829_v37  ;;  %v2643_v12 = vpop.f32.mrb[35].mxu0  ;;  %v2716_v13 = vpop.f32.mrb[27].mxu1  ;;  %3079 = vmatmul.mubr.bf16.gmra.mrb[44].mxu0 %v2823_v59  ;;  %3144 = vmatmul.mubr.bf16.gmra.mrb[36].mxu1 %v2825_v60  ;;  %v2743_v16 = vmax.f32 %v2638_v2, 0.0  ;;  %v2745_v17 = vmax.f32 %v2711_v3, 0.0 }
 0x98f   : > { %v2644_v14 = vadd.f32 %v2643_v12, %v5832_v38  ;;  %v2717_v15 = vadd.f32 %v2716_v13, %v5834_v0  ;;  %v2744_v20 = vmax.f32 %v2640_v6, 0.0  ;;  %v2746_v21 = vmax.f32 %v2713_v7, 0.0  ;;  %v5869_v0 = vld [vmem:[%s1129_s1] ss:$0 sm:$0xff] }
 0x990   : > { %v2747_v18 = vmax.f32 %v2642_v10, 0.0  ;;  %v2749_v19 = vmax.f32 %v2715_v11, 0.0 }
 0x991   : > { %v2748_v22 = vmax.f32 %v2644_v14, 0.0  ;;  %v2750_v23 = vmax.f32 %v2717_v15, 0.0 }
 0x992   : > { %v2827_v36 = vpack.c.bf16 %v2747_v18, %v2743_v16  ;;  %v2829_v24 = vpack.c.bf16 %v2749_v19, %v2745_v17 }
 0x993   : > { %v2828_v37 = vpack.c.bf16 %v2748_v22, %v2744_v20  ;;  %v2830_v25 = vpack.c.bf16 %v2750_v23, %v2746_v21 }
 0x995   : > { %3086 = vmatprep.mubr.bf16.mxu0 %v2828_v37  ;;  %3151 = vmatprep.mubr.bf16.mxu1 %v2830_v25 }
 0x996   : > { %3087 = vmatmul.mubr.bf16.gmra.mrb[48].mxu0 %v2827_v36  ;;  %3152 = vmatmul.mubr.bf16.gmra.mrb[40].mxu1 %v2829_v24 }
 0x9ee   : > { %v3865_v38 = vpop.f32.mrb[36].mxu0  ;;  %v3905_v26 = vpop.f32.mrb[28].mxu1 }
 0x9ef   : > { %v3866_v27 = vpop.f32.mrb[37].mxu0  ;;  %v3906_v28 = vpop.f32.mrb[29].mxu1 }
 0x9f0   : > { %v3867_v29 = vadd.f32 %v3866_v27, %v3865_v38  ;;  %v3907_v30 = vadd.f32 %v3906_v28, %v3905_v26  ;;  %v3868_v31 = vpop.f32.mrb[38].mxu0  ;;  %v3908_v32 = vpop.f32.mrb[30].mxu1 }
 0x9f1   : > { %v3869_v33 = vpop.f32.mrb[39].mxu0  ;;  %v3909_v34 = vpop.f32.mrb[31].mxu1 }
 0x9f2   : > { %v3065_v35 = vadd.f32 %v3867_v29, %v5869_v0  ;;  %v3870_v39 = vadd.f32 %v3869_v33, %v3868_v31  ;;  %v3910_v40 = vadd.f32 %v3909_v34, %v3908_v32 }
 0x9f4   : > { %v3130_v41 = vadd.f32 %v3907_v30, %v3065_v35  ;;  %v3068_v42 = vadd.f32 %v3870_v39, %v5869_v0 }
 0x9f6   : > { %4268 = vtanh.f32 %v3130_v41  ;;  %v3133_v43 = vadd.f32 %v3910_v40, %v3068_v42  ;;  %v3871_v44 = vpop.f32.mrb[40].mxu0  ;;  %v3911_v46 = vpop.f32.mrb[32].mxu1 }
 0x9f7   : > { %v3872_v47 = vpop.f32.mrb[41].mxu0  ;;  %v3912_v45 = vpop.f32.mrb[33].mxu1 }
 0x9f8   : > { %4270 = vtanh.f32 %v3133_v43  ;;  %v3873_v48 = vadd.f32 %v3872_v47, %v3871_v44  ;;  %v3913_v50 = vadd.f32 %v3912_v45, %v3911_v46  ;;  %v3874_v49 = vpop.f32.mrb[42].mxu0  ;;  %v3914_v51 = vpop.f32.mrb[34].mxu1 }
 0x9f9   : > { %v3875_v52 = vpop.f32.mrb[43].mxu0  ;;  %v3915_v53 = vpop.f32.mrb[35].mxu1 }
 0x9fa   : > { %v3073_v54 = vadd.f32 %v3873_v48, %v5869_v0  ;;  %v3876_v55 = vadd.f32 %v3875_v52, %v3874_v49  ;;  %v3916_v56 = vadd.f32 %v3915_v53, %v3914_v51 }
 0x9fc   : > { %v3138_v57 = vadd.f32 %v3913_v50, %v3073_v54  ;;  %v3076_v58 = vadd.f32 %v3876_v55, %v5869_v0 }
 0x9fe   : > { %4272 = vtanh.f32 %v3138_v57  ;;  %v3141_v59 = vadd.f32 %v3916_v56, %v3076_v58 }
 0xa00   : > { %v4269_v60 = vpop.eup %4268  ;;  %4274 = vtanh.f32 %v3141_v59 }
 0xa01   : > { %3168 = vst [vmem:[%s5879_s20] sm:$0xff] %v4269_v60 }
 0xa02   : > { %v4271_v61 = vpop.eup %4270 }
 0xa03   : > { %3169 = vst [vmem:[%s5879_s20 + $0x8] sm:$0xff] %v4271_v61 }
 0xa08   : > { %v4273_v62 = vpop.eup %4272 }
 0xa09   : > { %3170 = vst [vmem:[%s5879_s20 + $0x10] sm:$0xff] %v4273_v62 }
 0xa0a   : > { %v4275_v63 = vpop.eup %4274 }
 0xa0b   : > { %3171 = vst [vmem:[%s5879_s20 + $0x18] sm:$0xff] %v4275_v63 }
 0xa61   : > { %v3877_v1 = vpop.f32.mrb[44].mxu0  ;;  %v3917_v2 = vpop.f32.mrb[36].mxu1 }
 0xa62   : > { %v3878_v3 = vpop.f32.mrb[45].mxu0  ;;  %v3918_v4 = vpop.f32.mrb[37].mxu1 }
 0xa63   : > { %v3879_v5 = vadd.f32 %v3878_v3, %v3877_v1  ;;  %v3919_v6 = vadd.f32 %v3918_v4, %v3917_v2  ;;  %v3880_v7 = vpop.f32.mrb[46].mxu0  ;;  %v3920_v8 = vpop.f32.mrb[38].mxu1 }
 0xa64   : > { %v3881_v9 = vpop.f32.mrb[47].mxu0  ;;  %v3921_v10 = vpop.f32.mrb[39].mxu1 }
 0xa65   : > { %v3081_v11 = vadd.f32 %v3879_v5, %v5869_v0  ;;  %v3882_v12 = vadd.f32 %v3881_v9, %v3880_v7  ;;  %v3922_v13 = vadd.f32 %v3921_v10, %v3920_v8 }
 0xa67   : > { %v3146_v14 = vadd.f32 %v3919_v6, %v3081_v11  ;;  %v3084_v15 = vadd.f32 %v3882_v12, %v5869_v0 }
 0xa69   : > { %4276 = vtanh.f32 %v3146_v14  ;;  %v3149_v16 = vadd.f32 %v3922_v13, %v3084_v15  ;;  %v3883_v17 = vpop.f32.mrb[48].mxu0  ;;  %v3923_v18 = vpop.f32.mrb[40].mxu1 }
 0xa6a   : > { %v3884_v19 = vpop.f32.mrb[49].mxu0  ;;  %v3924_v20 = vpop.f32.mrb[41].mxu1 }
 0xa6b   : > { %4278 = vtanh.f32 %v3149_v16  ;;  %v3885_v21 = vadd.f32 %v3884_v19, %v3883_v17  ;;  %v3925_v22 = vadd.f32 %v3924_v20, %v3923_v18  ;;  %v3886_v23 = vpop.f32.mrb[50].mxu0  ;;  %v3926_v36 = vpop.f32.mrb[42].mxu1 }
 0xa6c   : > { %v3887_v24 = vpop.f32.mrb[51].mxu0  ;;  %v3927_v37 = vpop.f32.mrb[43].mxu1 }
 0xa6d   : > { %v3089_v25 = vadd.f32 %v3885_v21, %v5869_v0  ;;  %v3888_v38 = vadd.f32 %v3887_v24, %v3886_v23  ;;  %v3928_v26 = vadd.f32 %v3927_v37, %v3926_v36 }
 0xa6f   : > { %v3154_v27 = vadd.f32 %v3925_v22, %v3089_v25  ;;  %v3092_v28 = vadd.f32 %v3888_v38, %v5869_v0 }
 0xa71   : > { %4280 = vtanh.f32 %v3154_v27  ;;  %v3157_v29 = vadd.f32 %v3928_v26, %v3092_v28 }
 0xa73   : > { %v4277_v30 = vpop.eup %4276  ;;  %4282 = vtanh.f32 %v3157_v29 }
 0xa74   : > { %3172 = vst [vmem:[%s5879_s20 + $0x20] sm:$0xff] %v4277_v30 }
 0xa75   : > { %v4279_v31 = vpop.eup %4278 }
 0xa76   : > { %3173 = vst [vmem:[%s5879_s20 + $0x28] sm:$0xff] %v4279_v31 }
 0xa7b   : > { %v4281_v32 = vpop.eup %4280 }
 0xa7c   : > { %3174 = vst [vmem:[%s5879_s20 + $0x30] sm:$0xff] %v4281_v32 }
 0xa7d   : > { %v4283_v33 = vpop.eup %4282 }
 0xa7e   : > { %3175 = vst [vmem:[%s5879_s20 + $0x38] sm:$0xff] %v4283_v33 }
 0xa7f PF: > { %s6066_s28 = sld [smem:[#allocation37_spill]]  ;;  %s6067_s5 = sld [smem:[#allocation34_spill]] }
 0xa80   : > { %s6068_s26 = sld [smem:[#allocation35_spill]]  ;;  %s6069_s27 = sld [smem:[#allocation38_spill]] }
 0xa85   : > { %p51_p2 = scmp.ge.s32.totalorder %s6066_s28, 6  }
 0xa87   :  { %53 = sbr.rel (!%p51_p2) target bundleno = 37 (0x25), region = 318 }
 0xa8e   :  { %3197 = vsyncpa [#allocation4], 1 }
 0xa8f   :  { %3199 = vsyncpa [#allocation4 + $0x1], 1 }
 0xa90   :  { %3200 = vsyncpa [#allocation6], 1 }
 0xa91   :  { %3201 = vsyncpa [#allocation9], 1 }
 0xa92   :  { %3203 = vsyncpa [#allocation9 + $0x1], 1 }
 0xa93   :  { %3204 = vsyncpa [#allocation12], 1 }
 0xa94   :  { %3206 = vsyncpa [#allocation12 + $0x1], 1 }
 0xa95   :  { %3207 = vsyncpa [#allocation15], 1 }
 0xa96   :  { %3209 = vsyncpa [#allocation15 + $0x1], 1 }
 0xa97   :  { %3210 = vsyncpa [#allocation18], 1 }
 0xa98   :  { %3212 = vsyncpa [#allocation18 + $0x1], 1 }
 0xa99   :  { %3213 = vsyncpa [#allocation21], 1 }
 0xa9a   :  { %3215 = vsyncpa [#allocation21 + $0x1], 1 }
 0xa9b   :  { %3216 = vsyncpa [#allocation24], 1 }
 0xa9c   :  { %3218 = vsyncpa [#allocation24 + $0x1], 1 }

</bundles_post_ra>
